<compile_context>
chip_gen: v7x
topology: tpu7x:2x2x1
jax: 0.10.0
libtpu: 0.0.40
codegen_flags: <defaults>
</compile_context>

<pallas_src>
import jax
import jax.numpy as jnp
from jax.experimental import pallas as pl
from jax.experimental.pallas import tpu as pltpu

D_IN, D_H1, D_H2, D_OUT = 159, 2048, 256, 67
D_OUT_PAD = 128          # lane-dense output width (sliced back to 67 outside)
LEAK = 0.1               # nn.LeakyReLU(0.1) in the PyTorch model
H1_CHUNK = 512           # chunk of the 2048 hidden dim for the fc1->fc2 fusion
N_CHUNKS = D_H1 // H1_CHUNK


def _round_up(n, m):
    return ((n + m - 1) // m) * m


def _leaky_bf16(h_f32):
    """Cast the fp32 MXU result to bf16 once, then LeakyReLU in bf16.

    bf16 VALU on v6e/v7x halves the compare/select work and the intermediate
    bandwidth; on v5e it is still correct (the next matmul needs bf16 anyway).
    """
    hb = h_f32.astype(jnp.bfloat16)
    return jnp.where(hb > 0, hb, jnp.bfloat16(LEAK) * hb)


def mlp_kernel(x_ref, w1_ref, w2_ref, w3_ref, o_ref):
    x = x_ref[...].astype(jnp.bfloat16)              # (tm, 159)
    tm = x.shape[0]

    # Fused fc1 -> LeakyReLU -> fc2 over chunks of the 2048 hidden dim.
    # Never materializes the full (tm, 2048) h1; only (tm, H1_CHUNK) at a time.
    h2_acc = jnp.zeros((tm, D_H2), jnp.float32)
    for c in range(N_CHUNKS):                        # static unroll (4 chunks)
        lo, hi = c * H1_CHUNK, (c + 1) * H1_CHUNK
        h1c = jnp.dot(x, w1_ref[:, lo:hi],
                      preferred_element_type=jnp.float32)   # (tm, chunk) fp32
        h1c = _leaky_bf16(h1c)                               # (tm, chunk) bf16
        h2_acc = h2_acc + jnp.dot(h1c, w2_ref[lo:hi, :],
                                  preferred_element_type=jnp.float32)

    h2 = _leaky_bf16(h2_acc)                          # (tm, 256) bf16
    # fc3 (no activation); output block is lane-dense (128 wide, zero-padded w3).
    o_ref[...] = jnp.dot(h2, w3_ref[...],
                         preferred_element_type=jnp.float32).astype(o_ref.dtype)


def _choose_tile(B, tm_max):
    """Near-even batch tiling: pad <8 rows per tile; >=2 tiles for v7x megacore."""
    n_tiles = -(-B // tm_max)                 # ceil(B / tm_max)
    if n_tiles == 1 and B >= 16:
        n_tiles = 2                           # keep both v7x TensorCores busy
    tm = _round_up(-(-B // n_tiles), 8)       # round_up(ceil(B / n_tiles), 8)
    return tm, n_tiles * tm


def mlp_forward(x, w1_t, w2_t, w3_t_pad, *, tm_max=1024):
    """x: (B, 159) fp32; w1_t: (159, 2048) bf16; w2_t: (2048, 256) bf16;
    w3_t_pad: (256, 128) bf16 (zero-padded from 67 output columns).

    tm_max=1024 fits all generations at ~12 MiB VMEM; use 512 on v5e if the
    surrounding program is already VMEM-tight.
    """
    B = x.shape[0]
    tm, Bp = _choose_tile(B, tm_max)
    xp = x if Bp == B else jnp.pad(x, ((0, Bp - B), (0, 0)))   # <8 rows per tile

    flops = 2 * Bp * (D_IN * D_H1 + D_H1 * D_H2 + D_H2 * D_OUT_PAD)
    bytes_accessed = (Bp * D_IN * 4                    # x (fp32)
                      + (D_IN * D_H1 + D_H1 * D_H2 + D_H2 * D_OUT_PAD) * 2  # bf16 w
                      + Bp * D_OUT_PAD * 4)            # out (fp32)

    out = pl.pallas_call(
        mlp_kernel,
        out_shape=jax.ShapeDtypeStruct((Bp, D_OUT_PAD), jnp.float32),
        grid_spec=pltpu.PrefetchScalarGridSpec(
            num_scalar_prefetch=0,
            grid=(Bp // tm,),
            in_specs=[
                pl.BlockSpec((tm, D_IN), lambda i: (i, 0)),         # x tile
                pl.BlockSpec((D_IN, D_H1), lambda i: (0, 0)),       # w1 resident
                pl.BlockSpec((D_H1, D_H2), lambda i: (0, 0)),       # w2 resident
                pl.BlockSpec((D_H2, D_OUT_PAD), lambda i: (0, 0)),  # w3 resident
            ],
            out_specs=pl.BlockSpec((tm, D_OUT_PAD), lambda i: (i, 0)),
        ),
        compiler_params=pltpu.CompilerParams(
            dimension_semantics=("parallel",),       # shard batch tiles across TCs
            vmem_limit_bytes=32 * 1024 * 1024,       # headroom for big tiles (v5e)
        ),
        cost_estimate=pl.CostEstimate(flops=flops, transcendentals=0,
                                      bytes_accessed=bytes_accessed),
    )(xp, w1_t, w2_t, w3_t_pad)
    return out[:B, :D_OUT]


def init_params(key):
    """Mirror nn.Linear default weight init (U[-1/sqrt(fan_in), +1/sqrt(fan_in)]),
    stored transposed as (in, out), cast to bf16; w3 zero-padded to 128 columns.
    The PyTorch model uses bias=False everywhere, so there are no bias terms."""
    k1, k2, k3 = jax.random.split(key, 3)

    def uniform_w(k, fan_in, fan_out):
        bound = 1.0 / jnp.sqrt(jnp.float32(fan_in))
        return jax.random.uniform(k, (fan_in, fan_out), jnp.float32,
                                  minval=-bound, maxval=bound)

    w1_t = uniform_w(k1, D_IN, D_H1).astype(jnp.bfloat16)
    w2_t = uniform_w(k2, D_H1, D_H2).astype(jnp.bfloat16)
    w3_t = uniform_w(k3, D_H2, D_OUT).astype(jnp.bfloat16)
    w3_t_pad = jnp.pad(w3_t, ((0, 0), (0, D_OUT_PAD - D_OUT)))
    return w1_t, w2_t, w3_t_pad


def ref_forward(x, w1_t, w2_t, w3_t_pad):
    """Plain-JAX reference with the same bf16-operand / fp32-accum pattern."""
    h1 = jnp.dot(x.astype(jnp.bfloat16), w1_t, preferred_element_type=jnp.float32)
    h1 = _leaky_bf16(h1)
    h2 = jnp.dot(h1, w2_t, preferred_element_type=jnp.float32)
    h2 = _leaky_bf16(h2)
    o = jnp.dot(h2, w3_t_pad, preferred_element_type=jnp.float32)
    return o[:, :D_OUT]


if __name__ == "__main__":
    key = jax.random.PRNGKey(0)
    kx1, kx2, kp = jax.random.split(key, 3)
    w1_t, w2_t, w3_t_pad = init_params(kp)

    ok = True
    # B=8: single small tile. B=300: exercises multi-tile + near-even tiling
    # (2 tiles of 152 rows, only 4 padded rows).
    for kx, B in ((kx1, 8), (kx2, 300)):
        x = jax.random.normal(kx, (B, D_IN), jnp.float32)
        out = jax.block_until_ready(mlp_forward(x, w1_t, w2_t, w3_t_pad))
        ref = ref_forward(x, w1_t, w2_t, w3_t_pad)
        assert out.shape == (B, D_OUT), out.shape
        if not jnp.allclose(out, ref, atol=2e-2, rtol=2e-2):
            ok = False
            print(f"mismatch at B={B}: max abs err "
                  f"{float(jnp.max(jnp.abs(out - ref)))}")

    if ok:
        print("KERNEL_OK")
</pallas_src>

<mosaic_0001>
module attributes {stable_mosaic.version = 11 : i64} {
  func.func @mlp_kernel(%arg0: i32, %arg1: memref<8x159xf32, #tpu.memory_space<vmem>>, %arg2: memref<159x2048xbf16, #tpu.memory_space<vmem>>, %arg3: memref<2048x256xbf16, #tpu.memory_space<vmem>>, %arg4: memref<256x128xbf16, #tpu.memory_space<vmem>>, %arg5: memref<8x128xf32, #tpu.memory_space<vmem>>) attributes {dimension_semantics = [#tpu.dimension_semantics<parallel>], iteration_bounds = array<i64: 1>, scalar_prefetch = 0 : i64, scratch_operands = 0 : i64, tpu.core_type = #tpu.core_type<tc>, window_params = [{transform_indices = @transform_0, window_bounds = array<i64: 8, 159>}, {pipeline_mode = #tpu.pipeline_mode<synchronous>, transform_indices = @transform_1, window_bounds = array<i64: 159, 2048>}, {pipeline_mode = #tpu.pipeline_mode<synchronous>, transform_indices = @transform_2, window_bounds = array<i64: 2048, 256>}, {pipeline_mode = #tpu.pipeline_mode<synchronous>, transform_indices = @transform_3, window_bounds = array<i64: 256, 128>}, {transform_indices = @transform_4, window_bounds = array<i64: 8, 128>}]} {
    %c0 = arith.constant 0 : index
    %c0_0 = arith.constant 0 : index
    %0 = vector.load %arg1[%c0, %c0_0] : memref<8x159xf32, #tpu.memory_space<vmem>>, vector<8x159xf32>
    %1 = arith.truncf %0 : vector<8x159xf32> to vector<8x159xbf16>
    %cst = arith.constant 0.000000e+00 : f32
    %2 = vector.broadcast %cst : f32 to vector<8x256xf32>
    %c0_1 = arith.constant 0 : index
    %c0_2 = arith.constant 0 : index
    %3 = vector.load %arg2[%c0_1, %c0_2] : memref<159x2048xbf16, #tpu.memory_space<vmem>>, vector<159x512xbf16>
    %cst_3 = arith.constant dense<0.000000e+00> : vector<8x512xf32>
    %4 = tpu.matmul %1, %3, %cst_3 {dimension_numbers = #tpu.dot_dimension_numbers<[1], [0], [0], [1], [0, 0, 1, 1], [], []>} : vector<8x159xbf16>, vector<159x512xbf16>, vector<8x512xf32> -> vector<8x512xf32>
    %5 = arith.truncf %4 : vector<8x512xf32> to vector<8x512xbf16>
    %cst_4 = arith.constant 0.000000e+00 : bf16
    %6 = vector.broadcast %cst_4 : bf16 to vector<8x512xbf16>
    %7 = arith.cmpf ogt, %5, %6 : vector<8x512xbf16>
    %cst_5 = arith.constant 1.000980e-01 : bf16
    %8 = vector.broadcast %cst_5 : bf16 to vector<8x512xbf16>
    %9 = arith.mulf %8, %5 : vector<8x512xbf16>
    %10 = arith.select %7, %5, %9 : vector<8x512xi1>, vector<8x512xbf16>
    %c0_6 = arith.constant 0 : index
    %c0_7 = arith.constant 0 : index
    %11 = vector.load %arg3[%c0_6, %c0_7] : memref<2048x256xbf16, #tpu.memory_space<vmem>>, vector<512x256xbf16>
    %cst_8 = arith.constant dense<0.000000e+00> : vector<8x256xf32>
    %12 = tpu.matmul %10, %11, %cst_8 {dimension_numbers = #tpu.dot_dimension_numbers<[1], [0], [0], [1], [0, 0, 1, 1], [], []>} : vector<8x512xbf16>, vector<512x256xbf16>, vector<8x256xf32> -> vector<8x256xf32>
    %13 = arith.addf %2, %12 : vector<8x256xf32>
    %c0_9 = arith.constant 0 : index
    %c512 = arith.constant 512 : index
    %14 = vector.load %arg2[%c0_9, %c512] : memref<159x2048xbf16, #tpu.memory_space<vmem>>, vector<159x512xbf16>
    %cst_10 = arith.constant dense<0.000000e+00> : vector<8x512xf32>
    %15 = tpu.matmul %1, %14, %cst_10 {dimension_numbers = #tpu.dot_dimension_numbers<[1], [0], [0], [1], [0, 0, 1, 1], [], []>} : vector<8x159xbf16>, vector<159x512xbf16>, vector<8x512xf32> -> vector<8x512xf32>
    %16 = arith.truncf %15 : vector<8x512xf32> to vector<8x512xbf16>
    %cst_11 = arith.constant 0.000000e+00 : bf16
    %17 = vector.broadcast %cst_11 : bf16 to vector<8x512xbf16>
    %18 = arith.cmpf ogt, %16, %17 : vector<8x512xbf16>
    %cst_12 = arith.constant 1.000980e-01 : bf16
    %19 = vector.broadcast %cst_12 : bf16 to vector<8x512xbf16>
    %20 = arith.mulf %19, %16 : vector<8x512xbf16>
    %21 = arith.select %18, %16, %20 : vector<8x512xi1>, vector<8x512xbf16>
    %c512_13 = arith.constant 512 : index
    %c0_14 = arith.constant 0 : index
    %22 = vector.load %arg3[%c512_13, %c0_14] : memref<2048x256xbf16, #tpu.memory_space<vmem>>, vector<512x256xbf16>
    %cst_15 = arith.constant dense<0.000000e+00> : vector<8x256xf32>
    %23 = tpu.matmul %21, %22, %cst_15 {dimension_numbers = #tpu.dot_dimension_numbers<[1], [0], [0], [1], [0, 0, 1, 1], [], []>} : vector<8x512xbf16>, vector<512x256xbf16>, vector<8x256xf32> -> vector<8x256xf32>
    %24 = arith.addf %13, %23 : vector<8x256xf32>
    %c0_16 = arith.constant 0 : index
    %c1024 = arith.constant 1024 : index
    %25 = vector.load %arg2[%c0_16, %c1024] : memref<159x2048xbf16, #tpu.memory_space<vmem>>, vector<159x512xbf16>
    %cst_17 = arith.constant dense<0.000000e+00> : vector<8x512xf32>
    %26 = tpu.matmul %1, %25, %cst_17 {dimension_numbers = #tpu.dot_dimension_numbers<[1], [0], [0], [1], [0, 0, 1, 1], [], []>} : vector<8x159xbf16>, vector<159x512xbf16>, vector<8x512xf32> -> vector<8x512xf32>
    %27 = arith.truncf %26 : vector<8x512xf32> to vector<8x512xbf16>
    %cst_18 = arith.constant 0.000000e+00 : bf16
    %28 = vector.broadcast %cst_18 : bf16 to vector<8x512xbf16>
    %29 = arith.cmpf ogt, %27, %28 : vector<8x512xbf16>
    %cst_19 = arith.constant 1.000980e-01 : bf16
    %30 = vector.broadcast %cst_19 : bf16 to vector<8x512xbf16>
    %31 = arith.mulf %30, %27 : vector<8x512xbf16>
    %32 = arith.select %29, %27, %31 : vector<8x512xi1>, vector<8x512xbf16>
    %c1024_20 = arith.constant 1024 : index
    %c0_21 = arith.constant 0 : index
    %33 = vector.load %arg3[%c1024_20, %c0_21] : memref<2048x256xbf16, #tpu.memory_space<vmem>>, vector<512x256xbf16>
    %cst_22 = arith.constant dense<0.000000e+00> : vector<8x256xf32>
    %34 = tpu.matmul %32, %33, %cst_22 {dimension_numbers = #tpu.dot_dimension_numbers<[1], [0], [0], [1], [0, 0, 1, 1], [], []>} : vector<8x512xbf16>, vector<512x256xbf16>, vector<8x256xf32> -> vector<8x256xf32>
    %35 = arith.addf %24, %34 : vector<8x256xf32>
    %c0_23 = arith.constant 0 : index
    %c1536 = arith.constant 1536 : index
    %36 = vector.load %arg2[%c0_23, %c1536] : memref<159x2048xbf16, #tpu.memory_space<vmem>>, vector<159x512xbf16>
    %cst_24 = arith.constant dense<0.000000e+00> : vector<8x512xf32>
    %37 = tpu.matmul %1, %36, %cst_24 {dimension_numbers = #tpu.dot_dimension_numbers<[1], [0], [0], [1], [0, 0, 1, 1], [], []>} : vector<8x159xbf16>, vector<159x512xbf16>, vector<8x512xf32> -> vector<8x512xf32>
    %38 = arith.truncf %37 : vector<8x512xf32> to vector<8x512xbf16>
    %cst_25 = arith.constant 0.000000e+00 : bf16
    %39 = vector.broadcast %cst_25 : bf16 to vector<8x512xbf16>
    %40 = arith.cmpf ogt, %38, %39 : vector<8x512xbf16>
    %cst_26 = arith.constant 1.000980e-01 : bf16
    %41 = vector.broadcast %cst_26 : bf16 to vector<8x512xbf16>
    %42 = arith.mulf %41, %38 : vector<8x512xbf16>
    %43 = arith.select %40, %38, %42 : vector<8x512xi1>, vector<8x512xbf16>
    %c1536_27 = arith.constant 1536 : index
    %c0_28 = arith.constant 0 : index
    %44 = vector.load %arg3[%c1536_27, %c0_28] : memref<2048x256xbf16, #tpu.memory_space<vmem>>, vector<512x256xbf16>
    %cst_29 = arith.constant dense<0.000000e+00> : vector<8x256xf32>
    %45 = tpu.matmul %43, %44, %cst_29 {dimension_numbers = #tpu.dot_dimension_numbers<[1], [0], [0], [1], [0, 0, 1, 1], [], []>} : vector<8x512xbf16>, vector<512x256xbf16>, vector<8x256xf32> -> vector<8x256xf32>
    %46 = arith.addf %35, %45 : vector<8x256xf32>
    %47 = arith.truncf %46 : vector<8x256xf32> to vector<8x256xbf16>
    %cst_30 = arith.constant 0.000000e+00 : bf16
    %48 = vector.broadcast %cst_30 : bf16 to vector<8x256xbf16>
    %49 = arith.cmpf ogt, %47, %48 : vector<8x256xbf16>
    %cst_31 = arith.constant 1.000980e-01 : bf16
    %50 = vector.broadcast %cst_31 : bf16 to vector<8x256xbf16>
    %51 = arith.mulf %50, %47 : vector<8x256xbf16>
    %52 = arith.select %49, %47, %51 : vector<8x256xi1>, vector<8x256xbf16>
    %c0_32 = arith.constant 0 : index
    %c0_33 = arith.constant 0 : index
    %53 = vector.load %arg4[%c0_32, %c0_33] : memref<256x128xbf16, #tpu.memory_space<vmem>>, vector<256x128xbf16>
    %cst_34 = arith.constant dense<0.000000e+00> : vector<8x128xf32>
    %54 = tpu.matmul %52, %53, %cst_34 {dimension_numbers = #tpu.dot_dimension_numbers<[1], [0], [0], [1], [0, 0, 1, 1], [], []>} : vector<8x256xbf16>, vector<256x128xbf16>, vector<8x128xf32> -> vector<8x128xf32>
    %c0_35 = arith.constant 0 : index
    %c0_36 = arith.constant 0 : index
    %55 = vector.load %arg5[%c0_35, %c0_36] : memref<8x128xf32, #tpu.memory_space<vmem>>, vector<8x128xf32>
    tpu.vector_store %arg5[%c0_35, %c0_36], %54 {strides = array<i32>} : memref<8x128xf32, #tpu.memory_space<vmem>>, vector<8x128xf32>,
    return
  }
  func.func @transform_0(%arg0: i32) -> (i32, i32) {
    %c0_i32 = arith.constant 0 : i32
    %c0_i32_0 = arith.constant 0 : i32
    return %arg0, %c0_i32 : i32, i32
  }
  func.func @transform_1(%arg0: i32) -> (i32, i32) {
    %c0_i32 = arith.constant 0 : i32
    %c0_i32_0 = arith.constant 0 : i32
    %c0_i32_1 = arith.constant 0 : i32
    return %c0_i32, %c0_i32_0 : i32, i32
  }
  func.func @transform_2(%arg0: i32) -> (i32, i32) {
    %c0_i32 = arith.constant 0 : i32
    %c0_i32_0 = arith.constant 0 : i32
    %c0_i32_1 = arith.constant 0 : i32
    return %c0_i32, %c0_i32_0 : i32, i32
  }
  func.func @transform_3(%arg0: i32) -> (i32, i32) {
    %c0_i32 = arith.constant 0 : i32
    %c0_i32_0 = arith.constant 0 : i32
    %c0_i32_1 = arith.constant 0 : i32
    return %c0_i32, %c0_i32_0 : i32, i32
  }
  func.func @transform_4(%arg0: i32) -> (i32, i32) {
    %c0_i32 = arith.constant 0 : i32
    %c0_i32_0 = arith.constant 0 : i32
    return %arg0, %c0_i32 : i32, i32
  }
}

</mosaic_0001>

<bundles_post_ra>
// kernel: tpu_custom_call.1
= control target key start
LH: loop header
LB: loop body
LE: loop exit
PB: predicated region body
PF: predicated region fallthrough
CT: control target
= control target key end

     0   :  { %9 = vsyncpa [#allocation3], 0  ;;  %s4707_s0 = inlined_call_operand.hbm [shape: f32[8,159], index: 0, kind: input, shape index: {}]   ;;  %s4708_s1 = inlined_call_operand.hbm [shape: bf16[159,2048], index: 1, kind: input, shape index: {}]   ;;  %s4709_s2 = inlined_call_operand.hbm [shape: bf16[2048,256], index: 2, kind: input, shape index: {}]   ;;  %s4710_s3 = inlined_call_operand.hbm [shape: bf16[256,128], index: 3, kind: input, shape index: {}]   ;;  %s4711_s4 = inlined_call_operand.hbm [shape: f32[8,128], index: 4, kind: output, shape index: {}]  }
   0x1   :  { %10 = vsyncpa [#allocation6], 0 }
   0x2   :  { %11 = vsyncpa [#allocation9], 0 }
   0x3   :  { %12 = vsyncpa [#allocation4], 0  ;;  %s4548_s15 = smov [#allocation5]   ;;  %s4430_s19 = scalar_lea.hbm %s4708_s1, 20480 }
   0x4   :  { %s28_s16 = sshll.u32 %s4548_s15, 4  ;;  %p4431_p0 = scmp.ne.s32.totalorder %s4708_s1, %s4430_s19  ;;  %s29_s16 = int_to_ptr.vmem [resolvable:$true] %s28_s16 }
   0x5   :  { %p4434_p1 = scmp.lt.u32.totalorder %s4430_s19, %s4708_s1 }
   0x7   :  { %p4436_p2 = pnand %p4434_p1, %p4431_p0 }
   0x9   :  { %4439 = shalt.err (!%p4436_p2)
}
   0xa   :  { %s4440_s24 = scalar_lea.vmem %s29_s16, 20480  ;;  %p4445_p4 = scmp.lt.s32.totalorder %s29_s16, %s29_s16 }
   0xb   :  { %p4441_p3 = scmp.ne.s32.totalorder %s29_s16, %s4440_s24  ;;  %p4446_p5 = scmp.lt.s32.totalorder %s4440_s24, %s4440_s24 }
   0xd   :  { %p4447_p6 = por %p4446_p5, %p4445_p4 }
   0xf   :  { %p4448_p7 = pnand %p4447_p6, %p4441_p3 }
  0x11   :  { %4451 = shalt.err (!%p4448_p7)
}
  0x12   :  { %s4549_s25 = smov 1024   ;;  %s4550_s26 = smov 64  }
  0x13   :  { %34 = dma.hbm_to_vmem [thread:$0]  %s4708_s1, 20480, %s29_s16, [#allocation6], %s4549_s25, %s4549_s25, %s4550_s26  }
  0x14   :  { %s4551_s29 = smov [#allocation2]   ;;  %s4552_s5 = smov [#allocation7]  }
  0x15   :  { %s19_s30 = sshll.u32 %s4551_s29, 4  ;;  %s40_s6 = sshll.u32 %s4552_s5, 4  ;;  %s20_s30 = int_to_ptr.vmem [resolvable:$true] %s19_s30  ;;  %s41_s6 = int_to_ptr.vmem [resolvable:$true] %s40_s6 }
  0x16   :  { %s4452_s9 = scalar_lea.hbm %s4707_s0, 256 }
  0x17   :  { %p4453_p8 = scmp.ne.s32.totalorder %s4707_s0, %s4452_s9  ;;  %p4456_p9 = scmp.lt.u32.totalorder %s4452_s9, %s4707_s0 }
  0x19   :  { %p4458_p10 = pnand %p4456_p9, %p4453_p8 }
  0x1b   :  { %4461 = shalt.err (!%p4458_p10)
}
  0x1c   :  { %s4462_s1 = scalar_lea.vmem %s20_s30, 256  ;;  %p4467_p12 = scmp.lt.s32.totalorder %s20_s30, %s20_s30 }
  0x1d   :  { %p4463_p11 = scmp.ne.s32.totalorder %s20_s30, %s4462_s1  ;;  %p4468_p13 = scmp.lt.s32.totalorder %s4462_s1, %s4462_s1 }
  0x1f   :  { %p4469_p0 = por %p4468_p13, %p4467_p12 }
  0x21   :  { %p4470_p1 = pnand %p4469_p0, %p4463_p11 }
  0x23   :  { %4473 = shalt.err (!%p4470_p1)
}
  0x24   :  { %22 = dma.hbm_to_vmem [thread:$0]  %s4707_s0, 256, %s20_s30, [#allocation3]  }
  0x25   :  { %s4474_s18 = scalar_lea.hbm %s4709_s2, 32768 }
  0x26   :  { %p4475_p2 = scmp.ne.s32.totalorder %s4709_s2, %s4474_s18  ;;  %p4478_p3 = scmp.lt.u32.totalorder %s4474_s18, %s4709_s2 }
  0x28   :  { %p4480_p4 = pnand %p4478_p3, %p4475_p2 }
  0x2a   :  { %4483 = shalt.err (!%p4480_p4)
}
  0x2b   :  { %s4484_s23 = scalar_lea.vmem %s41_s6, 32768  ;;  %p4489_p6 = scmp.lt.s32.totalorder %s41_s6, %s41_s6 }
  0x2c   :  { %p4485_p5 = scmp.ne.s32.totalorder %s41_s6, %s4484_s23  ;;  %p4490_p7 = scmp.lt.s32.totalorder %s4484_s23, %s4484_s23 }
  0x2e   :  { %p4491_p8 = por %p4490_p7, %p4489_p6 }
  0x30   :  { %p4492_p9 = pnand %p4491_p8, %p4485_p5 }
  0x32   :  { %4495 = shalt.err (!%p4492_p9)
}
  0x33   :  { %s4553_s0 = smov 128   ;;  %s4554_s24 = smov 8  }
  0x34   :  { %46 = dma.hbm_to_vmem [thread:$0]  %s4709_s2, 32768, %s41_s6, [#allocation6], %s4553_s0, %s4553_s0, %s4554_s24  }
  0x35   :  { %s4555_s28 = smov [#allocation8]   ;;  %s4496_s7 = scalar_lea.hbm %s4710_s3, 2048 }
  0x36   :  { %s52_s29 = sshll.u32 %s4555_s28, 4  ;;  %p4497_p10 = scmp.ne.s32.totalorder %s4710_s3, %s4496_s7  ;;  %s53_s29 = int_to_ptr.vmem [resolvable:$true] %s52_s29 }
  0x37   :  { %p4500_p11 = scmp.lt.u32.totalorder %s4496_s7, %s4710_s3 }
  0x39   :  { %p4502_p12 = pnand %p4500_p11, %p4497_p10 }
  0x3b   :  { %4505 = shalt.err (!%p4502_p12)
}
  0x3c   :  { %s4506_s12 = scalar_lea.vmem %s53_s29, 2048  ;;  %p4511_p0 = scmp.lt.s32.totalorder %s53_s29, %s53_s29 }
  0x3d   :  { %p4507_p13 = scmp.ne.s32.totalorder %s53_s29, %s4506_s12  ;;  %p4512_p1 = scmp.lt.s32.totalorder %s4506_s12, %s4506_s12 }
  0x3f   :  { %p4513_p2 = por %p4512_p1, %p4511_p0 }
  0x41   :  { %p4514_p3 = pnand %p4513_p2, %p4507_p13 }
  0x43   :  { %4517 = shalt.err (!%p4514_p3)
}
  0x44   :  { %s4556_s2 = smov 4  }
  0x45   :  { %58 = dma.hbm_to_vmem [thread:$0]  %s4710_s3, 2048, %s53_s29, [#allocation9], %s4550_s26, %s4550_s26, %s4556_s2  }
  0x46   :  { %4540 = dma.done.wait [#allocation3], 256  }
  0x47   :  { %4541 = vsyncadd [#allocation3], 4294967040 }
  0x48   :  { %4542 = dma.done.wait [#allocation6], 53248  }
  0x49   :  { %4543 = vsyncadd [#allocation6], 4294914048 }
  0x4a   :  { %4544 = dma.done.wait [#allocation9], 2048  }
  0x4b   :  { %4545 = vsyncadd [#allocation9], 4294965248  ;;  %v77_v0 = vld [vmem:[#allocation5] sm:$0xff]  ;;  %v495_v9 = vld [vmem:[#allocation5 + $0x10] sm:$0xff]  ;;  %vm313_vm0 = vcmask 252928   ;;  %vm317_vm1 = vcmask 1046528  }
  0x4c   :  { %v79_v1 = vld [vmem:[#allocation5 + $0x40] sm:$0xff]  ;;  %v497_v10 = vld [vmem:[#allocation5 + $0x50] sm:$0xff]  ;;  %v74_v31 = vld [vmem:[#allocation2 + $0x8] sm:$0xff]  ;;  %vm318_vm2 = vcmask 1047552   ;;  %s4558_s3 = smov [#allocation10]  }
  0x4d   :  { %v81_v2 = vld [vmem:[#allocation5 + $0x80] sm:$0xff]  ;;  %v3532_v3 = vcombine.high %v77_v0, %v79_v1  ;;  %v3531_v4 = vcombine.low %v77_v0, %v79_v1  ;;  %v3574_v12 = vcombine.high %v495_v9, %v497_v10  ;;  %v3573_v13 = vcombine.low %v495_v9, %v497_v10  ;;  %v499_v14 = vld [vmem:[#allocation5 + $0x90] sm:$0xff]  ;;  %s3520_s26 = sshll.u32 %s4558_s3, 4  ;;  %s3521_s26 = int_to_ptr.vmem [resolvable:$true] %s3520_s26 }
  0x4e   :  { %v83_v5 = vld [vmem:[#allocation5 + $0xc0] sm:$0xff]  ;;  %v501_v15 = vld [vmem:[#allocation5 + $0xd0] sm:$0xff]  ;;  %v4635_v34 = vpack.c.bf16 %v74_v31, %v74_v31  ;;  %s4518_s1 = scalar_lea.vmem %s3521_s26, 128  ;;  %p4523_p5 = scmp.lt.s32.totalorder %s3521_s26, %s3521_s26 }
  0x4f   :  { %v3536_v6 = vcombine.high %v81_v2, %v83_v5  ;;  %v85_v7 = vld [vmem:[#allocation5 + $0x100] sm:$0xff]  ;;  %333 = vmatprep.subr.bf16.mxu1 %v3532_v3  ;;  %v3535_v11 = vcombine.low %v81_v2, %v83_v5  ;;  %v3578_v17 = vcombine.high %v499_v14, %v501_v15  ;;  %v503_v18 = vld [vmem:[#allocation5 + $0x110] sm:$0xff]  ;;  %743 = vmatprep.subr.bf16.mxu0 %v3574_v12  ;;  %v4557_v2 = vmov 65535   ;;  %p4519_p4 = scmp.ne.s32.totalorder %s3521_s26, %s4518_s1  ;;  %p4524_p6 = scmp.lt.s32.totalorder %s4518_s1, %s4518_s1 }
  0x50   :  { %v87_v8 = vld [vmem:[#allocation5 + $0x140] sm:$0xff]  ;;  %334 = vmatpush1.bf16.msra.mxu1 %v3531_v4  ;;  %v505_v19 = vld [vmem:[#allocation5 + $0x150] sm:$0xff]  ;;  %744 = vmatpush1.bf16.msra.mxu0 %v3573_v13  ;;  %v3577_v22 = vcombine.low %v499_v14, %v501_v15  ;;  %v319_v3 = vsel %vm317_vm1, 4294967295, %v4557_v2 }
  0x51   :  { %335 = vmatprep.subr.bf16.mxu1 %v3536_v6  ;;  %v3540_v16 = vcombine.high %v85_v7, %v87_v8  ;;  %v89_v20 = vld [vmem:[#allocation5 + $0x180] sm:$0xff]  ;;  %v3539_v23 = vcombine.low %v85_v7, %v87_v8  ;;  %745 = vmatprep.subr.bf16.mxu0 %v3578_v17  ;;  %v3582_v24 = vcombine.high %v503_v18, %v505_v19  ;;  %v507_v26 = vld [vmem:[#allocation5 + $0x190] sm:$0xff]  ;;  %v4641_v13 = vsel %vm318_vm2, %v319_v3, 0  ;;  %v108_v3 = vld [vmem:[#allocation5 + $0x3c8] sm:$0xff]  ;;  %p4525_p7 = por %p4524_p6, %p4523_p5 }
  0x52   :  { %v91_v21 = vld [vmem:[#allocation5 + $0x1c0] sm:$0xff]  ;;  %v509_v27 = vld [vmem:[#allocation5 + $0x1d0] sm:$0xff]  ;;  %v3581_v30 = vcombine.low %v503_v18, %v505_v19  ;;  %3571 = vmatprep.mubr.msk.bf16.mxu1 %vm313_vm0, %v4635_v34  ;;  %3613 = vmatprep.mubr.msk.bf16.mxu0 %vm313_vm0, %v4635_v34 }
  0x53   :  { %v3544_v25 = vcombine.high %v89_v20, %v91_v21  ;;  %v93_v28 = vld [vmem:[#allocation5 + $0x200] sm:$0xff]  ;;  %v3543_v32 = vcombine.low %v89_v20, %v91_v21  ;;  %v3586_v33 = vcombine.high %v507_v26, %v509_v27  ;;  %v511_v36 = vld [vmem:[#allocation5 + $0x210] sm:$0xff]  ;;  %v3585_v40 = vcombine.low %v507_v26, %v509_v27  ;;  %v78_v20 = vld [vmem:[#allocation5 + $0x8] sm:$0xff]  ;;  %p4526_p8 = pnand %p4525_p7, %p4519_p4 }
  0x54   :  { %336 = vmatpush1.bf16.msra.mxu1 %v3535_v11  ;;  %v95_v29 = vld [vmem:[#allocation5 + $0x240] sm:$0xff]  ;;  %746 = vmatpush1.bf16.msra.mxu0 %v3577_v22  ;;  %v513_v37 = vld [vmem:[#allocation5 + $0x250] sm:$0xff]  ;;  %v80_v21 = vld [vmem:[#allocation5 + $0x48] sm:$0xff] }
  0x55   :  { %337 = vmatprep.subr.bf16.mxu1 %v3540_v16  ;;  %747 = vmatprep.subr.bf16.mxu0 %v3582_v24  ;;  %v3548_v35 = vcombine.high %v93_v28, %v95_v29  ;;  %v97_v38 = vld [vmem:[#allocation5 + $0x280] sm:$0xff]  ;;  %v3547_v41 = vcombine.low %v93_v28, %v95_v29  ;;  %v3590_v42 = vcombine.high %v511_v36, %v513_v37  ;;  %v515_v44 = vld [vmem:[#allocation5 + $0x290] sm:$0xff]  ;;  %v82_v28 = vld [vmem:[#allocation5 + $0x88] sm:$0xff] }
  0x56   :  { %v99_v39 = vld [vmem:[#allocation5 + $0x2c0] sm:$0xff]  ;;  %v517_v45 = vld [vmem:[#allocation5 + $0x2d0] sm:$0xff]  ;;  %v3589_v48 = vcombine.low %v511_v36, %v513_v37  ;;  %v3534_v27 = vcombine.high %v78_v20, %v80_v21  ;;  %v84_v29 = vld [vmem:[#allocation5 + $0xc8] sm:$0xff] }
  0x57   :  { %v3552_v43 = vcombine.high %v97_v38, %v99_v39  ;;  %v101_v46 = vld [vmem:[#allocation5 + $0x300] sm:$0xff]  ;;  %v3551_v49 = vcombine.low %v97_v38, %v99_v39  ;;  %v3594_v50 = vcombine.high %v515_v44, %v517_v45  ;;  %v519_v52 = vld [vmem:[#allocation5 + $0x310] sm:$0xff]  ;;  %v3593_v56 = vcombine.low %v515_v44, %v517_v45  ;;  %v88_v37 = vld [vmem:[#allocation5 + $0x148] sm:$0xff] }
  0x58   :  { %338 = vmatpush1.bf16.msra.mxu1 %v3539_v23  ;;  %748 = vmatpush1.bf16.msra.mxu0 %v3581_v30  ;;  %v103_v47 = vld [vmem:[#allocation5 + $0x340] sm:$0xff]  ;;  %v521_v53 = vld [vmem:[#allocation5 + $0x350] sm:$0xff]  ;;  %v3537_v39 = vcombine.low %v82_v28, %v84_v29 }
  0x59   :  { %339 = vmatprep.subr.bf16.mxu1 %v3544_v25  ;;  %749 = vmatprep.subr.bf16.mxu0 %v3586_v33  ;;  %v3556_v51 = vcombine.high %v101_v46, %v103_v47  ;;  %v105_v54 = vld [vmem:[#allocation5 + $0x380] sm:$0xff]  ;;  %v3555_v57 = vcombine.low %v101_v46, %v103_v47  ;;  %v3598_v58 = vcombine.high %v519_v52, %v521_v53  ;;  %v523_v61 = vld [vmem:[#allocation5 + $0x390] sm:$0xff] }
  0x5a   :  { %v107_v55 = vld [vmem:[#allocation5 + $0x3c0] sm:$0xff]  ;;  %v525_v62 = vld [vmem:[#allocation5 + $0x3d0] sm:$0xff]  ;;  %v3597_v4 = vcombine.low %v519_v52, %v521_v53  ;;  %v3538_v33 = vcombine.high %v82_v28, %v84_v29  ;;  %v500_v28 = vld [vmem:[#allocation5 + $0x98] sm:$0xff] }
  0x5b   :  { %v3560_v59 = vcombine.high %v105_v54, %v107_v55  ;;  %v109_v60 = vld [vmem:[#allocation5 + $0x400] sm:$0xff]  ;;  %v3559_v5 = vcombine.low %v105_v54, %v107_v55  ;;  %v3602_v6 = vcombine.high %v523_v61, %v525_v62  ;;  %v527_v7 = vld [vmem:[#allocation5 + $0x410] sm:$0xff]  ;;  %v3601_v15 = vcombine.low %v523_v61, %v525_v62  ;;  %v98_v54 = vld [vmem:[#allocation5 + $0x288] sm:$0xff] }
  0x5c   :  { %340 = vmatpush1.bf16.msra.mxu1 %v3543_v32  ;;  %750 = vmatpush1.bf16.msra.mxu0 %v3585_v40  ;;  %v111_v63 = vld [vmem:[#allocation5 + $0x440] sm:$0xff]  ;;  %v529_v8 = vld [vmem:[#allocation5 + $0x450] sm:$0xff]  ;;  %v3533_v32 = vcombine.low %v78_v20, %v80_v21  ;;  %v100_v55 = vld [vmem:[#allocation5 + $0x2c8] sm:$0xff] }
  0x5d   :  { %341 = vmatprep.subr.bf16.mxu1 %v3548_v35  ;;  %751 = vmatprep.subr.bf16.mxu0 %v3590_v42  ;;  %v113_v0 = vld [vmem:[#allocation5 + $0x480] sm:$0xff]  ;;  %v3564_v9 = vcombine.high %v109_v60, %v111_v63  ;;  %v531_v11 = vld [vmem:[#allocation5 + $0x490] sm:$0xff]  ;;  %v3563_v14 = vcombine.low %v109_v60, %v111_v63  ;;  %v3606_v17 = vcombine.high %v527_v7, %v529_v8  ;;  %v86_v35 = vld [vmem:[#allocation5 + $0x108] sm:$0xff] }
  0x5e   :  { %v115_v1 = vld [vmem:[#allocation5 + $0x4c0] sm:$0xff]  ;;  %v533_v12 = vld [vmem:[#allocation5 + $0x4d0] sm:$0xff]  ;;  %v3605_v22 = vcombine.low %v527_v7, %v529_v8  ;;  %v90_v42 = vld [vmem:[#allocation5 + $0x188] sm:$0xff]  ;;  %v3541_v45 = vcombine.low %v86_v35, %v88_v37  ;;  %v3553_v63 = vcombine.low %v98_v54, %v100_v55 }
  0x5f   :  { %v3568_v10 = vcombine.high %v113_v0, %v115_v1  ;;  %v3567_v16 = vcombine.low %v113_v0, %v115_v1  ;;  %v3610_v18 = vcombine.high %v531_v11, %v533_v12  ;;  %v3609_v23 = vcombine.low %v531_v11, %v533_v12  ;;  %v73_v25 = vld [vmem:[#allocation2] sm:$0xff]  ;;  %v4032_v36 = vld [vmem:[#allocation7 + $0x4] ss:$8 sps:$4 sm:$0xff]   ;;  %v4030_v38 = vld [vmem:[#allocation7] ss:$8 sps:$4 sm:$0xff]  }
  0x60   :  { %342 = vmatpush1.bf16.msra.mxu1 %v3547_v41  ;;  %752 = vmatpush1.bf16.msra.mxu0 %v3589_v48  ;;  %v4646_v30 = vpack.c.bf16 %v73_v25, %v73_v25  ;;  %v4035_v40 = vld [vmem:[#allocation7 + $0x14] ss:$8 sps:$4 sm:$0xff]   ;;  %v3542_v41 = vcombine.high %v86_v35, %v88_v37  ;;  %v4033_v44 = vld [vmem:[#allocation7 + $0x10] ss:$8 sps:$4 sm:$0xff]   ;;  %v4038_v46 = vld [vmem:[#allocation7 + $0x24] ss:$8 sps:$4 sm:$0xff]  }
  0x61   :  { %343 = vmatprep.subr.bf16.mxu1 %v3552_v43  ;;  %753 = vmatprep.subr.bf16.mxu0 %v3594_v50  ;;  %v325_v19 = vand.u32 %v3568_v10, %v4641_v13  ;;  %v322_v24 = vand.u32 %v3567_v16, %v4641_v13  ;;  %v735_v26 = vand.u32 %v3610_v18, %v4641_v13  ;;  %v92_v43 = vld [vmem:[#allocation5 + $0x1c8] sm:$0xff]  ;;  %v4041_v52 = vld [vmem:[#allocation7 + $0x34] ss:$8 sps:$4 sm:$0xff]   ;;  %v4063_v18 = vld [vmem:[#allocation7 + $0x70] ss:$8 sps:$4 sm:$0xff]  }
  0x62   :  { %v732_v31 = vand.u32 %v3609_v23, %v4641_v13  ;;  %v3546_v47 = vcombine.high %v90_v42, %v92_v43  ;;  %v94_v48 = vld [vmem:[#allocation5 + $0x208] sm:$0xff]  ;;  %v4053_v1 = vld [vmem:[#allocation7 + $0x54] ss:$8 sps:$4 sm:$0xff]  }
  0x63   :  { %v4036_v50 = vld [vmem:[#allocation7 + $0x20] ss:$8 sps:$4 sm:$0xff]   ;;  %v498_v23 = vld [vmem:[#allocation5 + $0x58] sm:$0xff] }
  0x64   :  { %344 = vmatpush1.bf16.msra.mxu1 %v3551_v49  ;;  %754 = vmatpush1.bf16.msra.mxu0 %v3593_v56  ;;  %v96_v49 = vld [vmem:[#allocation5 + $0x248] sm:$0xff]  ;;  %v4039_v56 = vld [vmem:[#allocation7 + $0x30] ss:$8 sps:$4 sm:$0xff]  }
  0x65   :  { %345 = vmatprep.subr.bf16.mxu1 %v3556_v51  ;;  %755 = vmatprep.subr.bf16.mxu0 %v3598_v58  ;;  %v3545_v51 = vcombine.low %v90_v42, %v92_v43  ;;  %v3550_v53 = vcombine.high %v94_v48, %v96_v49  ;;  %v4047_v58 = vld [vmem:[#allocation7 + $0x44] ss:$8 sps:$4 sm:$0xff]   ;;  %v4045_v62 = vld [vmem:[#allocation7 + $0x40] ss:$8 sps:$4 sm:$0xff]   ;;  %v502_v29 = vld [vmem:[#allocation5 + $0xd8] sm:$0xff] }
  0x66   :  { %v102_v60 = vld [vmem:[#allocation5 + $0x308] sm:$0xff]  ;;  %v506_v37 = vld [vmem:[#allocation5 + $0x158] sm:$0xff] }
  0x67   :  { %v104_v61 = vld [vmem:[#allocation5 + $0x348] sm:$0xff]  ;;  %v508_v42 = vld [vmem:[#allocation5 + $0x198] sm:$0xff] }
  0x68   :  { %346 = vmatpush1.bf16.msra.mxu1 %v3555_v57  ;;  %756 = vmatpush1.bf16.msra.mxu0 %v3597_v4  ;;  %v3549_v57 = vcombine.low %v94_v48, %v96_v49  ;;  %v106_v0 = vld [vmem:[#allocation5 + $0x388] sm:$0xff]  ;;  %v3558_v2 = vcombine.high %v102_v60, %v104_v61  ;;  %v4051_v4 = vld [vmem:[#allocation7 + $0x50] ss:$8 sps:$4 sm:$0xff]  }
  0x69   :  { %347 = vmatprep.subr.bf16.mxu1 %v3560_v59  ;;  %757 = vmatprep.subr.bf16.mxu0 %v3602_v6  ;;  %v3554_v59 = vcombine.high %v98_v54, %v100_v55  ;;  %v3557_v6 = vcombine.low %v102_v60, %v104_v61  ;;  %v110_v7 = vld [vmem:[#allocation5 + $0x408] sm:$0xff]  ;;  %v3562_v11 = vcombine.high %v106_v0, %v108_v3  ;;  %v510_v43 = vld [vmem:[#allocation5 + $0x1d8] sm:$0xff] }
  0x6a   :  { %v112_v8 = vld [vmem:[#allocation5 + $0x448] sm:$0xff]  ;;  %v512_v48 = vld [vmem:[#allocation5 + $0x218] sm:$0xff] }
  0x6b   :  { %v116_v10 = vld [vmem:[#allocation5 + $0x4c8] sm:$0xff]  ;;  %v3566_v16 = vcombine.high %v110_v7, %v112_v8  ;;  %v3565_v20 = vcombine.low %v110_v7, %v112_v8  ;;  %v514_v49 = vld [vmem:[#allocation5 + $0x258] sm:$0xff] }
  0x6c   :  { %348 = vmatpush1.bf16.msra.mxu1 %v3559_v5  ;;  %758 = vmatpush1.bf16.msra.mxu0 %v3601_v15  ;;  %v4059_v5 = vld [vmem:[#allocation7 + $0x64] ss:$8 sps:$4 sm:$0xff]   ;;  %v4057_v12 = vld [vmem:[#allocation7 + $0x60] ss:$8 sps:$4 sm:$0xff]   ;;  %v3561_v15 = vcombine.low %v106_v0, %v108_v3  ;;  %v516_v54 = vld [vmem:[#allocation5 + $0x298] sm:$0xff] }
  0x6d   :  { %349 = vmatprep.subr.bf16.mxu1 %v3564_v9  ;;  %759 = vmatprep.subr.bf16.mxu0 %v3606_v17  ;;  %v114_v9 = vld [vmem:[#allocation5 + $0x488] sm:$0xff]  ;;  %v518_v55 = vld [vmem:[#allocation5 + $0x2d8] sm:$0xff] }
  0x6e   :  { %v3570_v17 = vcombine.high %v114_v9, %v116_v10  ;;  %v3569_v21 = vcombine.low %v114_v9, %v116_v10  ;;  %v4069_v25 = vld [vmem:[#allocation7 + $0x80] ss:$8 sps:$4 sm:$0xff]   ;;  %v520_v60 = vld [vmem:[#allocation5 + $0x318] sm:$0xff]  ;;  %v3595_v0 = vcombine.low %v516_v54, %v518_v55 }
  0x6f   :  { %v522_v61 = vld [vmem:[#allocation5 + $0x358] sm:$0xff] }
  0x70   :  { %350 = vmatpush1.bf16.msra.mxu1 %v3563_v14  ;;  %760 = vmatpush1.bf16.msra.mxu0 %v3605_v22  ;;  %v4065_v14 = vld [vmem:[#allocation7 + $0x74] ss:$8 sps:$4 sm:$0xff]   ;;  %v3600_v3 = vcombine.high %v520_v60, %v522_v61 }
  0x71   :  { %351 = vmatprep.subr.bf16.mxu1 %v325_v19  ;;  %761 = vmatprep.subr.bf16.mxu0 %v735_v26  ;;  %v4071_v19 = vld [vmem:[#allocation7 + $0x84] ss:$8 sps:$4 sm:$0xff]   ;;  %v496_v22 = vld [vmem:[#allocation5 + $0x18] sm:$0xff] }
  0x72   :  { %v4077_v26 = vld [vmem:[#allocation7 + $0x94] ss:$8 sps:$4 sm:$0xff]   ;;  %v3575_v35 = vcombine.low %v496_v22, %v498_v23 }
  0x73   :  { %v532_v7 = vld [vmem:[#allocation5 + $0x498] sm:$0xff] }
  0x74   :  { %352 = vmatpush1.bf16.msra.mxu1 %v322_v24  ;;  %762 = vmatpush1.bf16.msra.mxu0 %v732_v31  ;;  %v331_v24 = vand.u32 %v3570_v17, %v4641_v13  ;;  %v3576_v31 = vcombine.high %v496_v22, %v498_v23  ;;  %v534_v8 = vld [vmem:[#allocation5 + $0x4d8] sm:$0xff]  ;;  %v4044_v17 = vld [vmem:[#allocation7 + $0x204] ss:$8 sps:$4 sm:$0xff]  }
  0x75   :  { %374 = vmatprep.subr.bf16.mxu1 %v3534_v27  ;;  %1627 = vmatprep.subr.bf16.mxu0 %v4032_v36  ;;  %v328_v27 = vand.u32 %v3569_v21, %v4641_v13  ;;  %v504_v36 = vld [vmem:[#allocation5 + $0x118] sm:$0xff]  ;;  %v4056_v22 = vld [vmem:[#allocation7 + $0x224] ss:$8 sps:$4 sm:$0xff]  }
  0x76   :  { %v4048_v21 = vld [vmem:[#allocation7 + $0x210] ss:$8 sps:$4 sm:$0xff]   ;;  %v4113_v23 = vld [vmem:[#allocation7 + $0xf4] ss:$8 sps:$4 sm:$0xff]  }
  0x77   :  { %366 = vmatmul.mubr.bf16.vlgmr.msra.gmra.mrb[0].mxu1 %v4646_v30  ;;  %776 = vmatmul.mubr.bf16.vlgmr.msra.gmra.mrb[0].mxu0 %v4646_v30 }
  0x78   :  { %375 = vmatpush1.bf16.msra.mxu1 %v3533_v32  ;;  %3572 = vmatprep.mubr.msk.bf16.mxu1 %vm313_vm0, %v4635_v34  ;;  %v4075_v32 = vld [vmem:[#allocation7 + $0x90] ss:$8 sps:$4 sm:$0xff]  }
  0x79   :  { %376 = vmatprep.subr.bf16.mxu1 %v3538_v33  ;;  %1628 = vmatpush1.bf16.msra.mxu0 %v4030_v38  ;;  %v4083_v33 = vld [vmem:[#allocation7 + $0xa4] ss:$8 sps:$4 sm:$0xff]   ;;  %v3580_v38 = vcombine.high %v500_v28, %v502_v29 }
  0x7a   :  { %1629 = vmatprep.subr.bf16.mxu0 %v4035_v40  ;;  %v4089_v40 = vld [vmem:[#allocation7 + $0xb4] ss:$8 sps:$4 sm:$0xff]  }
  0x7c   :  { %377 = vmatpush1.bf16.msra.mxu1 %v3537_v39  ;;  %v4081_v39 = vld [vmem:[#allocation7 + $0xa0] ss:$8 sps:$4 sm:$0xff]  }
  0x7d   :  { %378 = vmatprep.subr.bf16.mxu1 %v3542_v41  ;;  %1630 = vmatpush1.bf16.msra.mxu0 %v4033_v44  ;;  %v3579_v41 = vcombine.low %v500_v28, %v502_v29  ;;  %v3584_v44 = vcombine.high %v504_v36, %v506_v37  ;;  %v4060_v28 = vld [vmem:[#allocation7 + $0x230] ss:$8 sps:$4 sm:$0xff]   ;;  %v4068_v29 = vld [vmem:[#allocation7 + $0x244] ss:$8 sps:$4 sm:$0xff]  }
  0x7e   :  { %1631 = vmatprep.subr.bf16.mxu0 %v4038_v46  ;;  %v4095_v46 = vld [vmem:[#allocation7 + $0xc4] ss:$8 sps:$4 sm:$0xff]  }
  0x80   :  { %379 = vmatpush1.bf16.msra.mxu1 %v3541_v45  ;;  %v4087_v45 = vld [vmem:[#allocation7 + $0xb0] ss:$8 sps:$4 sm:$0xff]  }
  0x81   :  { %380 = vmatprep.subr.bf16.mxu1 %v3546_v47  ;;  %1632 = vmatpush1.bf16.msra.mxu0 %v4036_v50  ;;  %v3583_v47 = vcombine.low %v504_v36, %v506_v37  ;;  %v3588_v50 = vcombine.high %v508_v42, %v510_v43  ;;  %v4078_v36 = vld [vmem:[#allocation7 + $0x260] ss:$8 sps:$4 sm:$0xff]   ;;  %v4086_v37 = vld [vmem:[#allocation7 + $0x274] ss:$8 sps:$4 sm:$0xff]  }
  0x82   :  { %1633 = vmatprep.subr.bf16.mxu0 %v4041_v52  ;;  %v4101_v52 = vld [vmem:[#allocation7 + $0xd4] ss:$8 sps:$4 sm:$0xff]  }
  0x84   :  { %381 = vmatpush1.bf16.msra.mxu1 %v3545_v51  ;;  %v4093_v51 = vld [vmem:[#allocation7 + $0xc0] ss:$8 sps:$4 sm:$0xff]  }
  0x85   :  { %382 = vmatprep.subr.bf16.mxu1 %v3550_v53  ;;  %1634 = vmatpush1.bf16.msra.mxu0 %v4039_v56  ;;  %v3587_v53 = vcombine.low %v508_v42, %v510_v43  ;;  %v3592_v56 = vcombine.high %v512_v48, %v514_v49  ;;  %v4096_v42 = vld [vmem:[#allocation7 + $0x290] ss:$8 sps:$4 sm:$0xff]   ;;  %v4104_v43 = vld [vmem:[#allocation7 + $0x2a4] ss:$8 sps:$4 sm:$0xff]  }
  0x86   :  { %1635 = vmatprep.subr.bf16.mxu0 %v4047_v58  ;;  %v4107_v58 = vld [vmem:[#allocation7 + $0xe4] ss:$8 sps:$4 sm:$0xff]  }
  0x88   :  { %383 = vmatpush1.bf16.msra.mxu1 %v3549_v57  ;;  %v4099_v57 = vld [vmem:[#allocation7 + $0xd0] ss:$8 sps:$4 sm:$0xff]  }
  0x89   :  { %384 = vmatprep.subr.bf16.mxu1 %v3554_v59  ;;  %1636 = vmatpush1.bf16.msra.mxu0 %v4045_v62  ;;  %v3591_v59 = vcombine.low %v512_v48, %v514_v49  ;;  %v3596_v62 = vcombine.high %v516_v54, %v518_v55  ;;  %v4114_v48 = vld [vmem:[#allocation7 + $0x2c0] ss:$8 sps:$4 sm:$0xff]   ;;  %v4122_v49 = vld [vmem:[#allocation7 + $0x2d4] ss:$8 sps:$4 sm:$0xff]   ;;  %v4132_v54 = vld [vmem:[#allocation7 + $0x2f0] ss:$8 sps:$4 sm:$0xff]  }
  0x8a   :  { %1637 = vmatprep.subr.bf16.mxu0 %v4053_v1  ;;  %v524_v1 = vld [vmem:[#allocation5 + $0x398] sm:$0xff]  ;;  %v4140_v55 = vld [vmem:[#allocation7 + $0x304] ss:$8 sps:$4 sm:$0xff]  }
  0x8c   :  { %385 = vmatpush1.bf16.msra.mxu1 %v3553_v63  ;;  %v4105_v63 = vld [vmem:[#allocation7 + $0xe0] ss:$8 sps:$4 sm:$0xff]  }
  0x8d   :  { %386 = vmatprep.subr.bf16.mxu1 %v3558_v2  ;;  %1638 = vmatpush1.bf16.msra.mxu0 %v4051_v4  ;;  %v526_v2 = vld [vmem:[#allocation5 + $0x3d8] sm:$0xff]  ;;  %v3599_v4 = vcombine.low %v520_v60, %v522_v61 }
  0x8e   :  { %1639 = vmatprep.subr.bf16.mxu0 %v4059_v5  ;;  %v528_v5 = vld [vmem:[#allocation5 + $0x418] sm:$0xff]  ;;  %v3604_v9 = vcombine.high %v524_v1, %v526_v2  ;;  %v3603_v10 = vcombine.low %v524_v1, %v526_v2 }
  0x90   :  { %387 = vmatpush1.bf16.msra.mxu1 %v3557_v6  ;;  %v530_v6 = vld [vmem:[#allocation5 + $0x458] sm:$0xff] }
  0x91   :  { %388 = vmatprep.subr.bf16.mxu1 %v3562_v11  ;;  %1640 = vmatpush1.bf16.msra.mxu0 %v4057_v12  ;;  %v3608_v11 = vcombine.high %v528_v5, %v530_v6  ;;  %v3612_v12 = vcombine.high %v532_v7, %v534_v8 }
  0x92   :  { %1641 = vmatprep.subr.bf16.mxu0 %v4065_v14  ;;  %v3607_v14 = vcombine.low %v528_v5, %v530_v6 }
  0x94   :  { %389 = vmatpush1.bf16.msra.mxu1 %v3561_v15  ;;  %v3611_v15 = vcombine.low %v532_v7, %v534_v8  ;;  %v4125_v7 = vld [vmem:[#allocation7 + $0x114] ss:$8 sps:$4 sm:$0xff]  }
  0x95   :  { %390 = vmatprep.subr.bf16.mxu1 %v3566_v16  ;;  %1642 = vmatpush1.bf16.msra.mxu0 %v4063_v18  ;;  %v741_v16 = vand.u32 %v3612_v12, %v4641_v13 }
  0x96   :  { %1643 = vmatprep.subr.bf16.mxu0 %v4071_v19  ;;  %v738_v18 = vand.u32 %v3611_v15, %v4641_v13  ;;  %v4042_v19 = vld [vmem:[#allocation7 + $0x200] ss:$8 sps:$4 sm:$0xff]   ;;  %v4123_v15 = vld [vmem:[#allocation7 + $0x110] ss:$8 sps:$4 sm:$0xff]  }
  0x98   :  { %391 = vmatpush1.bf16.msra.mxu1 %v3565_v20  ;;  %v4050_v20 = vld [vmem:[#allocation7 + $0x214] ss:$8 sps:$4 sm:$0xff]  }
  0x99   :  { %392 = vmatprep.subr.bf16.mxu1 %v331_v24  ;;  %1644 = vmatpush1.bf16.msra.mxu0 %v4069_v25  ;;  %v4054_v24 = vld [vmem:[#allocation7 + $0x220] ss:$8 sps:$4 sm:$0xff]   ;;  %v4111_v25 = vld [vmem:[#allocation7 + $0xf0] ss:$8 sps:$4 sm:$0xff]  }
  0x9a   :  { %1645 = vmatprep.subr.bf16.mxu0 %v4077_v26  ;;  %v4062_v26 = vld [vmem:[#allocation7 + $0x234] ss:$8 sps:$4 sm:$0xff]  }
  0x9c   :  { %393 = vmatpush1.bf16.msra.mxu1 %v328_v27  ;;  %v4119_v27 = vld [vmem:[#allocation7 + $0x104] ss:$8 sps:$4 sm:$0xff]  }
  0x9d   :  { %784 = vmatprep.subr.bf16.mxu1 %v3576_v31  ;;  %1646 = vmatpush1.bf16.msra.mxu0 %v4075_v32  ;;  %v4066_v31 = vld [vmem:[#allocation7 + $0x240] ss:$8 sps:$4 sm:$0xff]   ;;  %v4074_v32 = vld [vmem:[#allocation7 + $0x254] ss:$8 sps:$4 sm:$0xff]  }
  0x9e   :  { %1647 = vmatprep.subr.bf16.mxu0 %v4083_v33  ;;  %v4072_v33 = vld [vmem:[#allocation7 + $0x250] ss:$8 sps:$4 sm:$0xff]  }
  0x9f   :  { %407 = vmatmul.mubr.bf16.vlgmr.msra.gmra.mrb[4].mxu1 %v4646_v30 }
  0xa0   :  { %785 = vmatpush1.bf16.msra.mxu1 %v3575_v35  ;;  %3614 = vmatprep.mubr.msk.bf16.mxu1 %vm313_vm0, %v4635_v34  ;;  %v4080_v35 = vld [vmem:[#allocation7 + $0x264] ss:$8 sps:$4 sm:$0xff]  }
  0xa1   :  { %786 = vmatprep.subr.bf16.mxu1 %v3580_v38  ;;  %1648 = vmatpush1.bf16.msra.mxu0 %v4081_v39  ;;  %v4084_v38 = vld [vmem:[#allocation7 + $0x270] ss:$8 sps:$4 sm:$0xff]   ;;  %v4092_v39 = vld [vmem:[#allocation7 + $0x284] ss:$8 sps:$4 sm:$0xff]  }
  0xa2   :  { %1649 = vmatprep.subr.bf16.mxu0 %v4089_v40  ;;  %v4090_v40 = vld [vmem:[#allocation7 + $0x280] ss:$8 sps:$4 sm:$0xff]  }
  0xa4   :  { %787 = vmatpush1.bf16.msra.mxu1 %v3579_v41  ;;  %v4098_v41 = vld [vmem:[#allocation7 + $0x294] ss:$8 sps:$4 sm:$0xff]  }
  0xa5   :  { %788 = vmatprep.subr.bf16.mxu1 %v3584_v44  ;;  %1650 = vmatpush1.bf16.msra.mxu0 %v4087_v45  ;;  %v4102_v44 = vld [vmem:[#allocation7 + $0x2a0] ss:$8 sps:$4 sm:$0xff]   ;;  %v4110_v45 = vld [vmem:[#allocation7 + $0x2b4] ss:$8 sps:$4 sm:$0xff]  }
  0xa6   :  { %1651 = vmatprep.subr.bf16.mxu0 %v4095_v46  ;;  %v4108_v46 = vld [vmem:[#allocation7 + $0x2b0] ss:$8 sps:$4 sm:$0xff]  }
  0xa8   :  { %789 = vmatpush1.bf16.msra.mxu1 %v3583_v47  ;;  %v4116_v47 = vld [vmem:[#allocation7 + $0x2c4] ss:$8 sps:$4 sm:$0xff]  }
  0xa9   :  { %790 = vmatprep.subr.bf16.mxu1 %v3588_v50  ;;  %1652 = vmatpush1.bf16.msra.mxu0 %v4093_v51  ;;  %v4120_v50 = vld [vmem:[#allocation7 + $0x2d0] ss:$8 sps:$4 sm:$0xff]   ;;  %v4128_v51 = vld [vmem:[#allocation7 + $0x2e4] ss:$8 sps:$4 sm:$0xff]  }
  0xaa   :  { %1653 = vmatprep.subr.bf16.mxu0 %v4101_v52  ;;  %v4126_v52 = vld [vmem:[#allocation7 + $0x2e0] ss:$8 sps:$4 sm:$0xff]  }
  0xac   :  { %791 = vmatpush1.bf16.msra.mxu1 %v3587_v53  ;;  %v4134_v53 = vld [vmem:[#allocation7 + $0x2f4] ss:$8 sps:$4 sm:$0xff]  }
  0xad   :  { %792 = vmatprep.subr.bf16.mxu1 %v3592_v56  ;;  %1654 = vmatpush1.bf16.msra.mxu0 %v4099_v57 }
  0xae   :  { %1655 = vmatprep.subr.bf16.mxu0 %v4107_v58 }
  0xb0   :  { %793 = vmatpush1.bf16.msra.mxu1 %v3591_v59 }
  0xb1   :  { %794 = vmatprep.subr.bf16.mxu1 %v3596_v62  ;;  %1656 = vmatpush1.bf16.msra.mxu0 %v4105_v63 }
  0xb2   :  { %1657 = vmatprep.subr.bf16.mxu0 %v4113_v23  ;;  %v4150_v23 = vld [vmem:[#allocation7 + $0x320] ss:$8 sps:$4 sm:$0xff]  }
  0xb4   :  { %795 = vmatpush1.bf16.msra.mxu1 %v3595_v0 }
  0xb5   :  { %796 = vmatprep.subr.bf16.mxu1 %v3600_v3  ;;  %1658 = vmatpush1.bf16.msra.mxu0 %v4111_v25  ;;  %v4117_v3 = vld [vmem:[#allocation7 + $0x100] ss:$8 sps:$4 sm:$0xff]   ;;  %v4158_v25 = vld [vmem:[#allocation7 + $0x334] ss:$8 sps:$4 sm:$0xff]  }
  0xb6   :  { %1668 = vmatprep.subr.bf16.mxu0 %v4119_v27  ;;  %v4156_v27 = vld [vmem:[#allocation7 + $0x330] ss:$8 sps:$4 sm:$0xff]  }
  0xb8   :  { %797 = vmatpush1.bf16.msra.mxu1 %v3599_v4 }
  0xb9   :  { %798 = vmatprep.subr.bf16.mxu1 %v3604_v9 }
  0xbc   :  { %799 = vmatpush1.bf16.msra.mxu1 %v3603_v10 }
  0xbd   :  { %800 = vmatprep.subr.bf16.mxu1 %v3608_v11 }
  0xc0   :  { %801 = vmatpush1.bf16.msra.mxu1 %v3607_v14  ;;  %v4138_v14 = vld [vmem:[#allocation7 + $0x300] ss:$8 sps:$4 sm:$0xff]  }
  0xc1   :  { %802 = vmatprep.subr.bf16.mxu1 %v741_v16 }
  0xc4   :  { %803 = vmatpush1.bf16.msra.mxu1 %v738_v18  ;;  %v4131_v18 = vld [vmem:[#allocation7 + $0x124] ss:$8 sps:$4 sm:$0xff]  }
  0xc5   :  { %1225 = vmatprep.subr.bf16.mxu1 %v4044_v17  ;;  %v4146_v17 = vld [vmem:[#allocation7 + $0x314] ss:$8 sps:$4 sm:$0xff]  }
  0xc7   :  { %817 = vmatmul.mubr.bf16.vlgmr.msra.gmra.mrb[8].mxu1 %v4646_v30 }
  0xc8   :  { %1226 = vmatpush1.bf16.msra.mxu1 %v4042_v19  ;;  %v4144_v19 = vld [vmem:[#allocation7 + $0x310] ss:$8 sps:$4 sm:$0xff]  }
  0xc9   :  { %1227 = vmatprep.subr.bf16.mxu1 %v4050_v20  ;;  %v4129_v20 = vld [vmem:[#allocation7 + $0x120] ss:$8 sps:$4 sm:$0xff]  }
  0xcc   :  { %1228 = vmatpush1.bf16.msra.mxu1 %v4048_v21  ;;  %v4152_v21 = vld [vmem:[#allocation7 + $0x324] ss:$8 sps:$4 sm:$0xff]  }
  0xcd   :  { %1229 = vmatprep.subr.bf16.mxu1 %v4056_v22  ;;  %v4137_v22 = vld [vmem:[#allocation7 + $0x134] ss:$8 sps:$4 sm:$0xff]  }
  0xd0   :  { %1230 = vmatpush1.bf16.msra.mxu1 %v4054_v24  ;;  %v4135_v24 = vld [vmem:[#allocation7 + $0x130] ss:$8 sps:$4 sm:$0xff]  }
  0xd1   :  { %1231 = vmatprep.subr.bf16.mxu1 %v4062_v26  ;;  %v4143_v26 = vld [vmem:[#allocation7 + $0x144] ss:$8 sps:$4 sm:$0xff]  }
  0xd4   :  { %1232 = vmatpush1.bf16.msra.mxu1 %v4060_v28  ;;  %v4141_v28 = vld [vmem:[#allocation7 + $0x140] ss:$8 sps:$4 sm:$0xff]  }
  0xd5   :  { %1233 = vmatprep.subr.bf16.mxu1 %v4068_v29  ;;  %v4164_v29 = vld [vmem:[#allocation7 + $0x344] ss:$8 sps:$4 sm:$0xff]  }
  0xd8   :  { %1234 = vmatpush1.bf16.msra.mxu1 %v4066_v31  ;;  %v4149_v31 = vld [vmem:[#allocation7 + $0x154] ss:$8 sps:$4 sm:$0xff]  }
  0xd9   :  { %1235 = vmatprep.subr.bf16.mxu1 %v4074_v32  ;;  %v4162_v32 = vld [vmem:[#allocation7 + $0x340] ss:$8 sps:$4 sm:$0xff]  }
  0xdc   :  { %1236 = vmatpush1.bf16.msra.mxu1 %v4072_v33  ;;  %v4147_v33 = vld [vmem:[#allocation7 + $0x150] ss:$8 sps:$4 sm:$0xff]  }
  0xdd   :  { %1237 = vmatprep.subr.bf16.mxu1 %v4080_v35  ;;  %v4170_v35 = vld [vmem:[#allocation7 + $0x354] ss:$8 sps:$4 sm:$0xff]  }
  0xe0   :  { %1238 = vmatpush1.bf16.msra.mxu1 %v4078_v36  ;;  %v4155_v36 = vld [vmem:[#allocation7 + $0x164] ss:$8 sps:$4 sm:$0xff]  }
  0xe1   :  { %1239 = vmatprep.subr.bf16.mxu1 %v4086_v37  ;;  %v4168_v37 = vld [vmem:[#allocation7 + $0x350] ss:$8 sps:$4 sm:$0xff]  }
  0xe4   :  { %1240 = vmatpush1.bf16.msra.mxu1 %v4084_v38  ;;  %v4153_v38 = vld [vmem:[#allocation7 + $0x160] ss:$8 sps:$4 sm:$0xff]  }
  0xe5   :  { %1241 = vmatprep.subr.bf16.mxu1 %v4092_v39  ;;  %v4176_v39 = vld [vmem:[#allocation7 + $0x364] ss:$8 sps:$4 sm:$0xff]  }
  0xe8   :  { %1242 = vmatpush1.bf16.msra.mxu1 %v4090_v40  ;;  %v4161_v40 = vld [vmem:[#allocation7 + $0x174] ss:$8 sps:$4 sm:$0xff]  }
  0xe9   :  { %1243 = vmatprep.subr.bf16.mxu1 %v4098_v41  ;;  %v4174_v41 = vld [vmem:[#allocation7 + $0x360] ss:$8 sps:$4 sm:$0xff]  }
  0xec   :  { %1244 = vmatpush1.bf16.msra.mxu1 %v4096_v42  ;;  %v4159_v42 = vld [vmem:[#allocation7 + $0x170] ss:$8 sps:$4 sm:$0xff]  }
  0xed   :  { %1245 = vmatprep.subr.bf16.mxu1 %v4104_v43  ;;  %v4182_v43 = vld [vmem:[#allocation7 + $0x374] ss:$8 sps:$4 sm:$0xff]  }
  0xf0   :  { %1246 = vmatpush1.bf16.msra.mxu1 %v4102_v44  ;;  %v4167_v44 = vld [vmem:[#allocation7 + $0x184] ss:$8 sps:$4 sm:$0xff]  }
  0xf1   :  { %1247 = vmatprep.subr.bf16.mxu1 %v4110_v45  ;;  %v4180_v45 = vld [vmem:[#allocation7 + $0x370] ss:$8 sps:$4 sm:$0xff]  }
  0xf4   :  { %1248 = vmatpush1.bf16.msra.mxu1 %v4108_v46  ;;  %v4165_v46 = vld [vmem:[#allocation7 + $0x180] ss:$8 sps:$4 sm:$0xff]  }
  0xf5   :  { %1249 = vmatprep.subr.bf16.mxu1 %v4116_v47  ;;  %v4188_v47 = vld [vmem:[#allocation7 + $0x384] ss:$8 sps:$4 sm:$0xff]  }
  0xf8   :  { %1250 = vmatpush1.bf16.msra.mxu1 %v4114_v48  ;;  %v4173_v48 = vld [vmem:[#allocation7 + $0x194] ss:$8 sps:$4 sm:$0xff]  }
  0xf9   :  { %1251 = vmatprep.subr.bf16.mxu1 %v4122_v49 }
  0xfc   :  { %1252 = vmatpush1.bf16.msra.mxu1 %v4120_v50  ;;  %v4186_v50 = vld [vmem:[#allocation7 + $0x380] ss:$8 sps:$4 sm:$0xff]  }
  0xfd   :  { %1253 = vmatprep.subr.bf16.mxu1 %v4128_v51 }
 0x100   :  { %1254 = vmatpush1.bf16.msra.mxu1 %v4126_v52  ;;  %v4171_v52 = vld [vmem:[#allocation7 + $0x190] ss:$8 sps:$4 sm:$0xff]  }
 0x101   :  { %1255 = vmatprep.subr.bf16.mxu1 %v4134_v53  ;;  %v4194_v53 = vld [vmem:[#allocation7 + $0x394] ss:$8 sps:$4 sm:$0xff]  }
 0x104   :  { %1256 = vmatpush1.bf16.msra.mxu1 %v4132_v54 }
 0x105   :  { %1266 = vmatprep.subr.bf16.mxu1 %v4140_v55 }
 0x14a   :  { %v367_v56 = vpop.f32.mrb[0].mxu1  ;;  %v777_v63 = vpop.f32.mrb[0].mxu0 }
 0x14b   :  { %v415_v57 = vpack.c.bf16 %v367_v56, %v367_v56  ;;  %v369_v58 = vpop.f32.mrb[1].mxu1  ;;  %v825_v1 = vpack.c.bf16 %v777_v63, %v777_v63  ;;  %v779_v2 = vpop.f32.mrb[1].mxu0  ;;  %v4179_v56 = vld [vmem:[#allocation7 + $0x1a4] ss:$8 sps:$4 sm:$0xff]   ;;  %v4185_v63 = vld [vmem:[#allocation7 + $0x1b4] ss:$8 sps:$4 sm:$0xff]  }
 0x14c   :  { %v416_v59 = vpack.c.bf16 %v369_v58, %v369_v58  ;;  %v371_v60 = vpop.f32.mrb[2].mxu1  ;;  %v826_v4 = vpack.c.bf16 %v779_v2, %v779_v2  ;;  %v781_v5 = vpop.f32.mrb[2].mxu0  ;;  %v4206_v2 = vld [vmem:[#allocation7 + $0x3b4] ss:$8 sps:$4 sm:$0xff]  }
 0x14d   :  { %v423_v61 = vmul.bf16 1036860877, %v415_v57  ;;  %v372_v62 = vpop.f32.mrb[3].mxu1  ;;  %vm419_vm3 = vcmp.gt.bf16.partialorder %v415_v57, 0  ;;  %vm829_vm5 = vcmp.gt.bf16.partialorder %v825_v1, 0  ;;  %v782_v9 = vpop.f32.mrb[3].mxu0 }
 0x14e   :  { %v424_v0 = vmul.bf16 1036860877, %v416_v59  ;;  %vm420_vm4 = vcmp.gt.bf16.partialorder %v416_v59, 0  ;;  %v833_v8 = vmul.bf16 1036860877, %v825_v1  ;;  %vm830_vm6 = vcmp.gt.bf16.partialorder %v826_v4, 0 }
 0x14f   :  { %v427_v10 = vsel %vm419_vm3, %v415_v57, %v423_v61  ;;  %v834_v11 = vmul.bf16 1036860877, %v826_v4  ;;  %v4177_v60 = vld [vmem:[#allocation7 + $0x1a0] ss:$8 sps:$4 sm:$0xff]   ;;  %v4200_v61 = vld [vmem:[#allocation7 + $0x3a4] ss:$8 sps:$4 sm:$0xff]  }
 0x150   :  { %v428_v6 = vsel %vm420_vm4, %v416_v59, %v424_v0  ;;  %v837_v12 = vsel %vm829_vm5, %v825_v1, %v833_v8  ;;  %v4192_v59 = vld [vmem:[#allocation7 + $0x390] ss:$8 sps:$4 sm:$0xff]   ;;  %v4198_v0 = vld [vmem:[#allocation7 + $0x3a0] ss:$8 sps:$4 sm:$0xff]  }
 0x151   :  { %1659 = vmatprep.mubr.bf16.mxu0 %v428_v6  ;;  %v838_v16 = vsel %vm830_vm6, %v826_v4, %v834_v11  ;;  %v4183_v1 = vld [vmem:[#allocation7 + $0x1b0] ss:$8 sps:$4 sm:$0xff]   ;;  %v4189_v5 = vld [vmem:[#allocation7 + $0x1c0] ss:$8 sps:$4 sm:$0xff]   ;;  %v4212_v6 = vld [vmem:[#allocation7 + $0x3c4] ss:$8 sps:$4 sm:$0xff]  }
 0x152   :  { %1660 = vmatmul.mubr.bf16.vlgmr.msra.gmra.mrb[4].mxu0 %v427_v10  ;;  %1257 = vmatprep.mubr.bf16.mxu1 %v838_v16  ;;  %v4204_v4 = vld [vmem:[#allocation7 + $0x3b0] ss:$8 sps:$4 sm:$0xff]   ;;  %v4210_v8 = vld [vmem:[#allocation7 + $0x3c0] ss:$8 sps:$4 sm:$0xff]   ;;  %v4215_v10 = vld [vmem:[#allocation7 + $0x3d4] ss:$8 sps:$4 sm:$0xff]  }
 0x153   :  { %1669 = vmatpush1.bf16.msra.mxu0 %v4117_v3  ;;  %1258 = vmatmul.mubr.bf16.vlgmr.msra.gmra.mrb[12].mxu1 %v837_v12  ;;  %v4191_v3 = vld [vmem:[#allocation7 + $0x1c4] ss:$8 sps:$4 sm:$0xff]   ;;  %v4195_v9 = vld [vmem:[#allocation7 + $0x1d0] ss:$8 sps:$4 sm:$0xff]   ;;  %v4209_v16 = vld [vmem:[#allocation7 + $0x1f4] ss:$8 sps:$4 sm:$0xff]  }
 0x154   :  { %1670 = vmatprep.subr.bf16.mxu0 %v4125_v7  ;;  %1267 = vmatpush1.bf16.msra.mxu1 %v4138_v14  ;;  %v4197_v7 = vld [vmem:[#allocation7 + $0x1d4] ss:$8 sps:$4 sm:$0xff]   ;;  %v4203_v11 = vld [vmem:[#allocation7 + $0x1e4] ss:$8 sps:$4 sm:$0xff]   ;;  %v4213_v12 = vld [vmem:[#allocation7 + $0x3d0] ss:$8 sps:$4 sm:$0xff]  }
 0x155   :  { %1268 = vmatprep.subr.bf16.mxu1 %v4146_v17  ;;  %v4201_v14 = vld [vmem:[#allocation7 + $0x1e0] ss:$8 sps:$4 sm:$0xff]  }
 0x157   :  { %1671 = vmatpush1.bf16.msra.mxu0 %v4123_v15  ;;  %v4218_v15 = vld [vmem:[#allocation7 + $0x3e4] ss:$8 sps:$4 sm:$0xff]  }
 0x158   :  { %1672 = vmatprep.subr.bf16.mxu0 %v4131_v18  ;;  %1269 = vmatpush1.bf16.msra.mxu1 %v4144_v19  ;;  %v4216_v18 = vld [vmem:[#allocation7 + $0x3e0] ss:$8 sps:$4 sm:$0xff]   ;;  %v4207_v19 = vld [vmem:[#allocation7 + $0x1f0] ss:$8 sps:$4 sm:$0xff]  }
 0x159   :  { %1270 = vmatprep.subr.bf16.mxu1 %v4152_v21  ;;  %v1709_v21 = vld [vmem:[#allocation5 + $0x20] sm:$0xff] }
 0x15b   :  { %1673 = vmatpush1.bf16.msra.mxu0 %v4129_v20  ;;  %v4221_v20 = vld [vmem:[#allocation7 + $0x3f4] ss:$8 sps:$4 sm:$0xff]  }
 0x15c   :  { %1674 = vmatprep.subr.bf16.mxu0 %v4137_v22  ;;  %1271 = vmatpush1.bf16.msra.mxu1 %v4150_v23  ;;  %v1711_v22 = vld [vmem:[#allocation5 + $0x60] sm:$0xff] }
 0x15d   :  { %1272 = vmatprep.subr.bf16.mxu1 %v4158_v25  ;;  %v3744_v25 = vcombine.high %v1709_v21, %v1711_v22 }
 0x15f   :  { %1675 = vmatpush1.bf16.msra.mxu0 %v4135_v24  ;;  %v4219_v24 = vld [vmem:[#allocation7 + $0x3f0] ss:$8 sps:$4 sm:$0xff]  }
 0x160   :  { %1676 = vmatprep.subr.bf16.mxu0 %v4143_v26  ;;  %1273 = vmatpush1.bf16.msra.mxu1 %v4156_v27 }
 0x161   :  { %1274 = vmatprep.subr.bf16.mxu1 %v4164_v29 }
 0x163   :  { %1677 = vmatpush1.bf16.msra.mxu0 %v4141_v28 }
 0x164   :  { %1678 = vmatprep.subr.bf16.mxu0 %v4149_v31  ;;  %1275 = vmatpush1.bf16.msra.mxu1 %v4162_v32 }
 0x165   :  { %1276 = vmatprep.subr.bf16.mxu1 %v4170_v35 }
 0x167   :  { %1679 = vmatpush1.bf16.msra.mxu0 %v4147_v33 }
 0x168   :  { %1680 = vmatprep.subr.bf16.mxu0 %v4155_v36  ;;  %1277 = vmatpush1.bf16.msra.mxu1 %v4168_v37  ;;  %v1713_v36 = vld [vmem:[#allocation5 + $0xa0] sm:$0xff] }
 0x169   :  { %1278 = vmatprep.subr.bf16.mxu1 %v4176_v39  ;;  %v1715_v37 = vld [vmem:[#allocation5 + $0xe0] sm:$0xff]  ;;  %v3743_v39 = vcombine.low %v1709_v21, %v1711_v22 }
 0x16b   :  { %1681 = vmatpush1.bf16.msra.mxu0 %v4153_v38 }
 0x16c   :  { %1682 = vmatprep.subr.bf16.mxu0 %v4161_v40  ;;  %1279 = vmatpush1.bf16.msra.mxu1 %v4174_v41  ;;  %v4222_v40 = vld [vmem:[#allocation7 + $0x400] ss:$8 sps:$4 sm:$0xff]   ;;  %v4224_v41 = vld [vmem:[#allocation7 + $0x404] ss:$8 sps:$4 sm:$0xff]  }
 0x16d   :  { %1280 = vmatprep.subr.bf16.mxu1 %v4182_v43  ;;  %v3748_v43 = vcombine.high %v1713_v36, %v1715_v37 }
 0x16f   :  { %1683 = vmatpush1.bf16.msra.mxu0 %v4159_v42 }
 0x170   :  { %1684 = vmatprep.subr.bf16.mxu0 %v4167_v44  ;;  %1281 = vmatpush1.bf16.msra.mxu1 %v4180_v45  ;;  %v1717_v45 = vld [vmem:[#allocation5 + $0x120] sm:$0xff] }
 0x171   :  { %1282 = vmatprep.subr.bf16.mxu1 %v4188_v47  ;;  %v3747_v47 = vcombine.low %v1713_v36, %v1715_v37 }
 0x172   :  { %v408_v49 = vpop.f32.mrb[4].mxu1 }
 0x173   :  { %1685 = vmatpush1.bf16.msra.mxu0 %v4165_v46  ;;  %v410_v51 = vpop.f32.mrb[5].mxu1  ;;  %v417_v17 = vpack.c.bf16 %v408_v49, %v408_v49  ;;  %v1719_v46 = vld [vmem:[#allocation5 + $0x160] sm:$0xff]  ;;  %v4227_v49 = vld [vmem:[#allocation7 + $0x414] ss:$8 sps:$4 sm:$0xff]  }
 0x174   :  { %v418_v54 = vpack.c.bf16 %v410_v51, %v410_v51  ;;  %v412_v55 = vpop.f32.mrb[6].mxu1  ;;  %1686 = vmatprep.subr.bf16.mxu0 %v4173_v48  ;;  %1283 = vmatpush1.bf16.msra.mxu1 %v4186_v50  ;;  %v4225_v48 = vld [vmem:[#allocation7 + $0x410] ss:$8 sps:$4 sm:$0xff]   ;;  %v3752_v50 = vcombine.high %v1717_v45, %v1719_v46  ;;  %v1721_v51 = vld [vmem:[#allocation5 + $0x1a0] sm:$0xff] }
 0x175   :  { %v413_v57 = vpop.f32.mrb[7].mxu1  ;;  %1284 = vmatprep.subr.bf16.mxu1 %v4194_v53  ;;  %v425_v23 = vmul.bf16 1036860877, %v417_v17  ;;  %vm421_vm8 = vcmp.gt.bf16.partialorder %v417_v17, 0  ;;  %v3751_v53 = vcombine.low %v1717_v45, %v1719_v46  ;;  %v4230_v55 = vld [vmem:[#allocation7 + $0x424] ss:$8 sps:$4 sm:$0xff]  }
 0x176   :  { %v426_v58 = vmul.bf16 1036860877, %v418_v54  ;;  %vm422_vm7 = vcmp.gt.bf16.partialorder %v418_v54, 0  ;;  %v1725_v57 = vld [vmem:[#allocation5 + $0x220] sm:$0xff]  ;;  %v1730_v46 = vld [vmem:[#allocation5 + $0x2a8] sm:$0xff] }
 0x177   :  { %1687 = vmatpush1.bf16.msra.mxu0 %v4171_v52  ;;  %v429_v26 = vsel %vm421_vm8, %v417_v17, %v425_v23  ;;  %v1723_v52 = vld [vmem:[#allocation5 + $0x1e0] sm:$0xff] }
 0x178   :  { %1688 = vmatprep.subr.bf16.mxu0 %v4179_v56  ;;  %v430_v62 = vsel %vm422_vm7, %v418_v54, %v426_v58  ;;  %1285 = vmatpush1.bf16.msra.mxu1 %v4192_v59  ;;  %v4228_v54 = vld [vmem:[#allocation7 + $0x420] ss:$8 sps:$4 sm:$0xff]   ;;  %v3756_v56 = vcombine.high %v1721_v51, %v1723_v52  ;;  %v3755_v59 = vcombine.low %v1721_v51, %v1723_v52 }
 0x179   :  { %1700 = vmatprep.mubr.bf16.mxu0 %v430_v62  ;;  %1286 = vmatprep.subr.bf16.mxu1 %v4200_v61  ;;  %v1727_v58 = vld [vmem:[#allocation5 + $0x260] sm:$0xff]  ;;  %v4233_v61 = vld [vmem:[#allocation7 + $0x434] ss:$8 sps:$4 sm:$0xff]   ;;  %v1736_v51 = vld [vmem:[#allocation5 + $0x368] sm:$0xff] }
 0x17a   :  { %v3760_v62 = vcombine.high %v1725_v57, %v1727_v58  ;;  %v1747_v17 = vld [vmem:[#allocation5 + $0x4e0] sm:$0xff] }
 0x17b   :  { %1689 = vmatpush1.bf16.msra.mxu0 %v4177_v60  ;;  %v4231_v60 = vld [vmem:[#allocation7 + $0x430] ss:$8 sps:$4 sm:$0xff]  }
 0x17c   :  { %1690 = vmatprep.subr.bf16.mxu0 %v4185_v63  ;;  %1287 = vmatpush1.bf16.msra.mxu1 %v4198_v0  ;;  %v1729_v63 = vld [vmem:[#allocation5 + $0x2a0] sm:$0xff] }
 0x17d   :  { %1288 = vmatprep.subr.bf16.mxu1 %v4206_v2  ;;  %v1731_v0 = vld [vmem:[#allocation5 + $0x2e0] sm:$0xff] }
 0x17e   :  { %v4234_v2 = vld [vmem:[#allocation7 + $0x440] ss:$8 sps:$4 sm:$0xff]  }
 0x17f   :  { %1691 = vmatpush1.bf16.msra.mxu0 %v4183_v1  ;;  %v3759_v1 = vcombine.low %v1725_v57, %v1727_v58  ;;  %v1742_v58 = vld [vmem:[#allocation5 + $0x428] sm:$0xff] }
 0x180   :  { %1692 = vmatprep.subr.bf16.mxu0 %v4191_v3  ;;  %1289 = vmatpush1.bf16.msra.mxu1 %v4204_v4  ;;  %v4236_v3 = vld [vmem:[#allocation7 + $0x444] ss:$8 sps:$4 sm:$0xff]   ;;  %v3764_v4 = vcombine.high %v1729_v63, %v1731_v0 }
 0x181   :  { %1290 = vmatprep.subr.bf16.mxu1 %v4212_v6  ;;  %v1735_v6 = vld [vmem:[#allocation5 + $0x360] sm:$0xff] }
 0x183   :  { %1693 = vmatpush1.bf16.msra.mxu0 %v4189_v5  ;;  %v1733_v5 = vld [vmem:[#allocation5 + $0x320] sm:$0xff] }
 0x184   :  { %1694 = vmatprep.subr.bf16.mxu0 %v4197_v7  ;;  %1291 = vmatpush1.bf16.msra.mxu1 %v4210_v8  ;;  %v3763_v7 = vcombine.low %v1729_v63, %v1731_v0  ;;  %v3768_v8 = vcombine.high %v1733_v5, %v1735_v6 }
 0x185   :  { %1292 = vmatprep.subr.bf16.mxu1 %v4215_v10  ;;  %v1739_v10 = vld [vmem:[#allocation5 + $0x3e0] sm:$0xff] }
 0x187   :  { %1695 = vmatpush1.bf16.msra.mxu0 %v4195_v9  ;;  %v1737_v9 = vld [vmem:[#allocation5 + $0x3a0] sm:$0xff] }
 0x188   :  { %1696 = vmatprep.subr.bf16.mxu0 %v4203_v11  ;;  %1293 = vmatpush1.bf16.msra.mxu1 %v4213_v12  ;;  %v3767_v11 = vcombine.low %v1733_v5, %v1735_v6  ;;  %v3772_v12 = vcombine.high %v1737_v9, %v1739_v10  ;;  %v2525_v5 = vld [vmem:[#allocation5 + $0x70] sm:$0xff] }
 0x189   :  { %1294 = vmatprep.subr.bf16.mxu1 %v4218_v15  ;;  %v1743_v15 = vld [vmem:[#allocation5 + $0x460] sm:$0xff] }
 0x18b   :  { %1697 = vmatpush1.bf16.msra.mxu0 %v4201_v14  ;;  %v1741_v14 = vld [vmem:[#allocation5 + $0x420] sm:$0xff] }
 0x18c   :  { %1698 = vmatprep.subr.bf16.mxu0 %v4209_v16  ;;  %1295 = vmatpush1.bf16.msra.mxu1 %v4216_v18  ;;  %v1745_v16 = vld [vmem:[#allocation5 + $0x4a0] sm:$0xff]  ;;  %v3771_v18 = vcombine.low %v1737_v9, %v1739_v10  ;;  %v3775_v21 = vcombine.low %v1741_v14, %v1743_v15  ;;  %v2529_v9 = vld [vmem:[#allocation5 + $0xf0] sm:$0xff] }
 0x18d   :  { %1296 = vmatprep.subr.bf16.mxu1 %v4221_v20  ;;  %v3780_v20 = vcombine.high %v1745_v16, %v1747_v17  ;;  %v3779_v22 = vcombine.low %v1745_v16, %v1747_v17  ;;  %v2535_v17 = vld [vmem:[#allocation5 + $0x1b0] sm:$0xff] }
 0x18f   :  { %1699 = vmatpush1.bf16.msra.mxu0 %v4207_v19  ;;  %v3776_v19 = vcombine.high %v1741_v14, %v1743_v15  ;;  %v1949_v23 = vand.u32 %v3780_v20, %v4641_v13  ;;  %v2533_v14 = vld [vmem:[#allocation5 + $0x170] sm:$0xff] }
 0x190   :  { %1297 = vmatpush1.bf16.msra.mxu1 %v4219_v24  ;;  %2439 = vmatprep.subr.bf16.mxu0 %v4224_v41  ;;  %v1710_v24 = vld [vmem:[#allocation5 + $0x28] sm:$0xff] }
 0x191   :  { %1957 = vmatprep.subr.bf16.mxu1 %v3744_v25  ;;  %v1712_v25 = vld [vmem:[#allocation5 + $0x68] sm:$0xff] }
 0x192   :  { %1701 = vmatmul.mubr.bf16.vlgmr.msra.gmra.mrb[4].mxu0 %v429_v26  ;;  %v1946_v26 = vand.u32 %v3779_v22, %v4641_v13 }
 0x193   :  { %2440 = vmatpush1.bf16.msra.mxu0 %v4222_v40 }
 0x194   :  { %2441 = vmatprep.subr.bf16.mxu0 %v4227_v49 }
 0x197   :  { %2442 = vmatpush1.bf16.msra.mxu0 %v4225_v48 }
 0x198   :  { %2443 = vmatprep.subr.bf16.mxu0 %v4230_v55  ;;  %v1740_v55 = vld [vmem:[#allocation5 + $0x3e8] sm:$0xff] }
 0x19a   :  { %v818_v27 = vpop.f32.mrb[8].mxu1 }
 0x19b   :  { %v827_v28 = vpack.c.bf16 %v818_v27, %v818_v27  ;;  %v820_v29 = vpop.f32.mrb[9].mxu1  ;;  %2444 = vmatpush1.bf16.msra.mxu0 %v4228_v54  ;;  %v3746_v27 = vcombine.high %v1710_v24, %v1712_v25  ;;  %v1738_v54 = vld [vmem:[#allocation5 + $0x3a8] sm:$0xff] }
 0x19c   :  { %v828_v31 = vpack.c.bf16 %v820_v29, %v820_v29  ;;  %v822_v32 = vpop.f32.mrb[10].mxu1  ;;  %2445 = vmatprep.subr.bf16.mxu0 %v4233_v61  ;;  %v1716_v29 = vld [vmem:[#allocation5 + $0xe8] sm:$0xff]  ;;  %v3774_v57 = vcombine.high %v1738_v54, %v1740_v55 }
 0x19d   :  { %v835_v33 = vmul.bf16 1036860877, %v827_v28  ;;  %v823_v35 = vpop.f32.mrb[11].mxu1  ;;  %vm831_vm9 = vcmp.gt.bf16.partialorder %v827_v28, 0  ;;  %v1748_v61 = vld [vmem:[#allocation5 + $0x4e8] sm:$0xff] }
 0x19e   :  { %v836_v38 = vmul.bf16 1036860877, %v828_v31  ;;  %vm832_vm10 = vcmp.gt.bf16.partialorder %v828_v31, 0  ;;  %v1720_v35 = vld [vmem:[#allocation5 + $0x168] sm:$0xff] }
 0x19f   :  { %v839_v44 = vsel %vm831_vm9, %v827_v28, %v835_v33  ;;  %2446 = vmatpush1.bf16.msra.mxu0 %v4231_v60  ;;  %v1714_v28 = vld [vmem:[#allocation5 + $0xa8] sm:$0xff] }
 0x1a0   :  { %v840_v42 = vsel %vm832_vm10, %v828_v31, %v836_v38  ;;  %2447 = vmatprep.subr.bf16.mxu0 %v4236_v3  ;;  %v3745_v31 = vcombine.low %v1710_v24, %v1712_v25  ;;  %v3750_v32 = vcombine.high %v1714_v28, %v1716_v29  ;;  %v1718_v33 = vld [vmem:[#allocation5 + $0x128] sm:$0xff]  ;;  %v3749_v36 = vcombine.low %v1714_v28, %v1716_v29  ;;  %v2539_v24 = vld [vmem:[#allocation5 + $0x230] sm:$0xff] }
 0x1a1   :  { %1298 = vmatprep.mubr.bf16.mxu1 %v840_v42  ;;  %v3754_v37 = vcombine.high %v1718_v33, %v1720_v35  ;;  %v1722_v38 = vld [vmem:[#allocation5 + $0x1a8] sm:$0xff]  ;;  %v3753_v40 = vcombine.low %v1718_v33, %v1720_v35  ;;  %v2541_v25 = vld [vmem:[#allocation5 + $0x270] sm:$0xff] }
 0x1a2   :  { %1299 = vmatmul.mubr.bf16.vlgmr.msra.gmra.mrb[12].mxu1 %v839_v44  ;;  %v1726_v42 = vld [vmem:[#allocation5 + $0x228] sm:$0xff]  ;;  %v3866_v29 = vcombine.high %v2539_v24, %v2541_v25  ;;  %v4243_v33 = vld [vmem:[#allocation7 + $0x470] ss:$8 sps:$4 sm:$0xff]  }
 0x1a3   :  { %1958 = vmatpush1.bf16.msra.mxu1 %v3743_v39  ;;  %3783 = vmatprep.mubr.msk.bf16.mxu1 %vm313_vm0, %v4635_v34  ;;  %v1724_v39 = vld [vmem:[#allocation5 + $0x1e8] sm:$0xff] }
 0x1a4   :  { %1959 = vmatprep.subr.bf16.mxu1 %v3748_v43  ;;  %2448 = vmatpush1.bf16.msra.mxu0 %v4234_v2  ;;  %v3758_v41 = vcombine.high %v1722_v38, %v1724_v39  ;;  %v1728_v43 = vld [vmem:[#allocation5 + $0x268] sm:$0xff]  ;;  %v3757_v44 = vcombine.low %v1722_v38, %v1724_v39  ;;  %v2547_v38 = vld [vmem:[#allocation5 + $0x330] sm:$0xff] }
 0x1a5   :  { %v3762_v45 = vcombine.high %v1726_v42, %v1728_v43  ;;  %v3761_v48 = vcombine.low %v1726_v42, %v1728_v43  ;;  %v1746_v60 = vld [vmem:[#allocation5 + $0x4a8] sm:$0xff]  ;;  %v2549_v39 = vld [vmem:[#allocation5 + $0x370] sm:$0xff] }
 0x1a6   :  { %v3782_v0 = vcombine.high %v1746_v60, %v1748_v61  ;;  %v3781_v2 = vcombine.low %v1746_v60, %v1748_v61  ;;  %v4248_v35 = vld [vmem:[#allocation7 + $0x484] ss:$8 sps:$4 sm:$0xff]   ;;  %v3874_v43 = vcombine.high %v2547_v38, %v2549_v39 }
 0x1a7   :  { %1960 = vmatpush1.bf16.msra.mxu1 %v3747_v47  ;;  %v1732_v47 = vld [vmem:[#allocation5 + $0x2e8] sm:$0xff] }
 0x1a8   :  { %1961 = vmatprep.subr.bf16.mxu1 %v3752_v50  ;;  %v3766_v49 = vcombine.high %v1730_v46, %v1732_v47  ;;  %v1734_v50 = vld [vmem:[#allocation5 + $0x328] sm:$0xff]  ;;  %v3765_v52 = vcombine.low %v1730_v46, %v1732_v47  ;;  %v1955_v3 = vand.u32 %v3782_v0, %v4641_v13  ;;  %v1952_v6 = vand.u32 %v3781_v2, %v4641_v13  ;;  %v4249_v46 = vld [vmem:[#allocation7 + $0x490] ss:$8 sps:$4 sm:$0xff]  }
 0x1a9   :  { %v4254_v47 = vld [vmem:[#allocation7 + $0x4a4] ss:$8 sps:$4 sm:$0xff]   ;;  %v2524_v0 = vld [vmem:[#allocation5 + $0x38] sm:$0xff]  ;;  %v4258_v2 = vld [vmem:[#allocation7 + $0x4c0] ss:$8 sps:$4 sm:$0xff]  }
 0x1aa   :  { %v4260_v60 = vld [vmem:[#allocation7 + $0x4c4] ss:$8 sps:$4 sm:$0xff]  }
 0x1ab   :  { %1962 = vmatpush1.bf16.msra.mxu1 %v3751_v53  ;;  %v3770_v53 = vcombine.high %v1734_v50, %v1736_v51 }
 0x1ac   :  { %1963 = vmatprep.subr.bf16.mxu1 %v3756_v56  ;;  %v3769_v56 = vcombine.low %v1734_v50, %v1736_v51  ;;  %v2555_v50 = vld [vmem:[#allocation5 + $0x430] sm:$0xff] }
 0x1ad   :  { %v2557_v51 = vld [vmem:[#allocation5 + $0x470] sm:$0xff] }
 0x1ae   :  { %v3881_v61 = vcombine.low %v2555_v50, %v2557_v51 }
 0x1af   :  { %1964 = vmatpush1.bf16.msra.mxu1 %v3755_v59  ;;  %v1744_v59 = vld [vmem:[#allocation5 + $0x468] sm:$0xff] }
 0x1b0   :  { %1965 = vmatprep.subr.bf16.mxu1 %v3760_v62  ;;  %v3773_v62 = vcombine.low %v1738_v54, %v1740_v55  ;;  %v3778_v63 = vcombine.high %v1742_v58, %v1744_v59  ;;  %v4252_v54 = vld [vmem:[#allocation7 + $0x4a0] ss:$8 sps:$4 sm:$0xff]   ;;  %v4257_v55 = vld [vmem:[#allocation7 + $0x4b4] ss:$8 sps:$4 sm:$0xff]  }
 0x1b3   :  { %1966 = vmatpush1.bf16.msra.mxu1 %v3759_v1  ;;  %v3777_v1 = vcombine.low %v1742_v58, %v1744_v59  ;;  %v4255_v59 = vld [vmem:[#allocation7 + $0x4b0] ss:$8 sps:$4 sm:$0xff]  }
 0x1b4   :  { %1967 = vmatprep.subr.bf16.mxu1 %v3764_v4  ;;  %v2523_v4 = vld [vmem:[#allocation5 + $0x30] sm:$0xff] }
 0x1b5   :  { %v3849_v10 = vcombine.low %v2523_v4, %v2525_v5 }
 0x1b7   :  { %1968 = vmatpush1.bf16.msra.mxu1 %v3763_v7  ;;  %v3850_v7 = vcombine.high %v2523_v4, %v2525_v5 }
 0x1b8   :  { %1969 = vmatprep.subr.bf16.mxu1 %v3768_v8  ;;  %v2527_v8 = vld [vmem:[#allocation5 + $0xb0] sm:$0xff] }
 0x1b9   :  { %v3853_v15 = vcombine.low %v2527_v8, %v2529_v9 }
 0x1bb   :  { %1970 = vmatpush1.bf16.msra.mxu1 %v3767_v11  ;;  %v3854_v11 = vcombine.high %v2527_v8, %v2529_v9  ;;  %v4261_v8 = vld [vmem:[#allocation7 + $0x4d0] ss:$8 sps:$4 sm:$0xff]   ;;  %v4266_v9 = vld [vmem:[#allocation7 + $0x4e4] ss:$8 sps:$4 sm:$0xff]  }
 0x1bc   :  { %1971 = vmatprep.subr.bf16.mxu1 %v3772_v12  ;;  %v2531_v12 = vld [vmem:[#allocation5 + $0x130] sm:$0xff] }
 0x1bd   :  { %v3858_v16 = vcombine.high %v2531_v12, %v2533_v14  ;;  %v3857_v20 = vcombine.low %v2531_v12, %v2533_v14  ;;  %v2532_v12 = vld [vmem:[#allocation5 + $0x138] sm:$0xff] }
 0x1be   :  { %v2534_v14 = vld [vmem:[#allocation5 + $0x178] sm:$0xff] }
 0x1bf   :  { %1972 = vmatpush1.bf16.msra.mxu1 %v3771_v18  ;;  %v2537_v18 = vld [vmem:[#allocation5 + $0x1f0] sm:$0xff] }
 0x1c0   :  { %1973 = vmatprep.subr.bf16.mxu1 %v3776_v19  ;;  %v4239_v19 = vld [vmem:[#allocation7 + $0x454] ss:$8 sps:$4 sm:$0xff]   ;;  %v3862_v22 = vcombine.high %v2535_v17, %v2537_v18  ;;  %v3861_v28 = vcombine.low %v2535_v17, %v2537_v18  ;;  %v3860_v17 = vcombine.high %v2532_v12, %v2534_v14 }
 0x1c1   :  { %2449 = vmatprep.subr.bf16.mxu0 %v4239_v19  ;;  %v2536_v18 = vld [vmem:[#allocation5 + $0x1b8] sm:$0xff] }
 0x1c2   :  { %v2538_v19 = vld [vmem:[#allocation5 + $0x1f8] sm:$0xff] }
 0x1c3   :  { %1974 = vmatpush1.bf16.msra.mxu1 %v3775_v21  ;;  %v4237_v21 = vld [vmem:[#allocation7 + $0x450] ss:$8 sps:$4 sm:$0xff]  }
 0x1c4   :  { %1975 = vmatprep.subr.bf16.mxu1 %v1949_v23  ;;  %v4242_v23 = vld [vmem:[#allocation7 + $0x464] ss:$8 sps:$4 sm:$0xff]   ;;  %2450 = vmatpush1.bf16.msra.mxu0 %v4237_v21  ;;  %v3859_v21 = vcombine.low %v2532_v12, %v2534_v14  ;;  %v4288_v14 = vld [vmem:[#allocation7 + $0x560] ss:$8 sps:$4 sm:$0xff]  }
 0x1c5   :  { %2451 = vmatprep.subr.bf16.mxu0 %v4242_v23  ;;  %v3864_v23 = vcombine.high %v2536_v18, %v2538_v19  ;;  %v4290_v12 = vld [vmem:[#allocation7 + $0x564] ss:$8 sps:$4 sm:$0xff]  }
 0x1c7   :  { %1976 = vmatpush1.bf16.msra.mxu1 %v1946_v26  ;;  %v4240_v26 = vld [vmem:[#allocation7 + $0x460] ss:$8 sps:$4 sm:$0xff]  }
 0x1c8   :  { %1998 = vmatprep.subr.bf16.mxu1 %v3746_v27  ;;  %v4245_v27 = vld [vmem:[#allocation7 + $0x474] ss:$8 sps:$4 sm:$0xff]   ;;  %2452 = vmatpush1.bf16.msra.mxu0 %v4240_v26  ;;  %v4272_v26 = vld [vmem:[#allocation7 + $0x504] ss:$8 sps:$4 sm:$0xff]  }
 0x1c9   :  { %2453 = vmatprep.subr.bf16.mxu0 %v4245_v27  ;;  %v3863_v27 = vcombine.low %v2536_v18, %v2538_v19  ;;  %v4294_v18 = vld [vmem:[#allocation7 + $0x580] ss:$8 sps:$4 sm:$0xff]   ;;  %v4299_v19 = vld [vmem:[#allocation7 + $0x594] ss:$8 sps:$4 sm:$0xff]  }
 0x1ca   :  { %1990 = vmatmul.mubr.bf16.vlgmr.msra.gmra.mrb[16].mxu1 %v4646_v30 }
 0x1cb   :  { %1999 = vmatpush1.bf16.msra.mxu1 %v3745_v31  ;;  %3784 = vmatprep.mubr.msk.bf16.mxu1 %vm313_vm0, %v4635_v34  ;;  %v2543_v31 = vld [vmem:[#allocation5 + $0x2b0] sm:$0xff] }
 0x1cc   :  { %2000 = vmatprep.subr.bf16.mxu1 %v3750_v32  ;;  %v2545_v32 = vld [vmem:[#allocation5 + $0x2f0] sm:$0xff]  ;;  %2454 = vmatpush1.bf16.msra.mxu0 %v4243_v33  ;;  %v2548_v33 = vld [vmem:[#allocation5 + $0x338] sm:$0xff] }
 0x1cd   :  { %2455 = vmatprep.subr.bf16.mxu0 %v4248_v35  ;;  %v3869_v42 = vcombine.low %v2543_v31, %v2545_v32  ;;  %v2550_v35 = vld [vmem:[#allocation5 + $0x378] sm:$0xff] }
 0x1cf   :  { %2001 = vmatpush1.bf16.msra.mxu1 %v3749_v36  ;;  %v3865_v36 = vcombine.low %v2539_v24, %v2541_v25  ;;  %v2540_v24 = vld [vmem:[#allocation5 + $0x238] sm:$0xff] }
 0x1d0   :  { %2002 = vmatprep.subr.bf16.mxu1 %v3754_v37  ;;  %v3870_v37 = vcombine.high %v2543_v31, %v2545_v32  ;;  %v2542_v25 = vld [vmem:[#allocation5 + $0x278] sm:$0xff] }
 0x1d1   :  { %v3867_v31 = vcombine.low %v2540_v24, %v2542_v25 }
 0x1d3   :  { %2003 = vmatpush1.bf16.msra.mxu1 %v3753_v40  ;;  %v4246_v40 = vld [vmem:[#allocation7 + $0x480] ss:$8 sps:$4 sm:$0xff]  }
 0x1d4   :  { %2004 = vmatprep.subr.bf16.mxu1 %v3758_v41  ;;  %v4251_v41 = vld [vmem:[#allocation7 + $0x494] ss:$8 sps:$4 sm:$0xff]   ;;  %2456 = vmatpush1.bf16.msra.mxu0 %v4246_v40  ;;  %v3875_v40 = vcombine.low %v2548_v33, %v2550_v35 }
 0x1d5   :  { %2457 = vmatprep.subr.bf16.mxu0 %v4251_v41 }
 0x1d7   :  { %2005 = vmatpush1.bf16.msra.mxu1 %v3757_v44  ;;  %v2551_v44 = vld [vmem:[#allocation5 + $0x3b0] sm:$0xff] }
 0x1d8   :  { %2006 = vmatprep.subr.bf16.mxu1 %v3762_v45  ;;  %v2553_v45 = vld [vmem:[#allocation5 + $0x3f0] sm:$0xff]  ;;  %2458 = vmatpush1.bf16.msra.mxu0 %v4249_v46 }
 0x1d9   :  { %2459 = vmatprep.subr.bf16.mxu0 %v4254_v47 }
 0x1db   :  { %2007 = vmatpush1.bf16.msra.mxu1 %v3761_v48  ;;  %v3873_v48 = vcombine.low %v2547_v38, %v2549_v39  ;;  %v2552_v38 = vld [vmem:[#allocation5 + $0x3b8] sm:$0xff] }
 0x1dc   :  { %2008 = vmatprep.subr.bf16.mxu1 %v3766_v49  ;;  %v3878_v49 = vcombine.high %v2551_v44, %v2553_v45  ;;  %2460 = vmatpush1.bf16.msra.mxu0 %v4252_v54  ;;  %v2554_v39 = vld [vmem:[#allocation5 + $0x3f8] sm:$0xff] }
 0x1dd   :  { %2461 = vmatprep.subr.bf16.mxu0 %v4257_v55  ;;  %v3880_v41 = vcombine.high %v2552_v38, %v2554_v39  ;;  %v3879_v46 = vcombine.low %v2552_v38, %v2554_v39  ;;  %v4312_v38 = vld [vmem:[#allocation7 + $0x5e0] ss:$8 sps:$4 sm:$0xff]   ;;  %v4317_v39 = vld [vmem:[#allocation7 + $0x5f4] ss:$8 sps:$4 sm:$0xff]  }
 0x1df   :  { %2009 = vmatpush1.bf16.msra.mxu1 %v3765_v52  ;;  %v2559_v52 = vld [vmem:[#allocation5 + $0x4b0] sm:$0xff] }
 0x1e0   :  { %2010 = vmatprep.subr.bf16.mxu1 %v3770_v53  ;;  %v2561_v53 = vld [vmem:[#allocation5 + $0x4f0] sm:$0xff]  ;;  %2462 = vmatpush1.bf16.msra.mxu0 %v4255_v59 }
 0x1e1   :  { %v3886_v58 = vcombine.high %v2559_v52, %v2561_v53  ;;  %2463 = vmatprep.subr.bf16.mxu0 %v4260_v60 }
 0x1e3   :  { %2011 = vmatpush1.bf16.msra.mxu1 %v3769_v56  ;;  %v3877_v56 = vcombine.low %v2551_v44, %v2553_v45  ;;  %v2560_v44 = vld [vmem:[#allocation5 + $0x4b8] sm:$0xff] }
 0x1e4   :  { %2012 = vmatprep.subr.bf16.mxu1 %v3774_v57  ;;  %v3882_v57 = vcombine.high %v2555_v50, %v2557_v51  ;;  %2464 = vmatpush1.bf16.msra.mxu0 %v4258_v2  ;;  %v2562_v45 = vld [vmem:[#allocation5 + $0x4f8] sm:$0xff] }
 0x1e5   :  { %v3887_v50 = vcombine.low %v2560_v44, %v2562_v45  ;;  %v4275_v2 = vld [vmem:[#allocation7 + $0x514] ss:$8 sps:$4 sm:$0xff]  }
 0x1e7   :  { %2013 = vmatpush1.bf16.msra.mxu1 %v3773_v62  ;;  %v3885_v62 = vcombine.low %v2559_v52, %v2561_v53  ;;  %v2766_v52 = vand.u32 %v3887_v50, %v4641_v13  ;;  %v4321_v50 = vld [vmem:[#allocation7 + $0x610] ss:$8 sps:$4 sm:$0xff]  }
 0x1e8   :  { %2014 = vmatprep.subr.bf16.mxu1 %v3778_v63  ;;  %v2763_v63 = vand.u32 %v3886_v58, %v4641_v13 }
 0x1e9   :  { %v2760_v4 = vand.u32 %v3885_v62, %v4641_v13 }
 0x1eb   :  { %2015 = vmatpush1.bf16.msra.mxu1 %v3777_v1  ;;  %v2526_v1 = vld [vmem:[#allocation5 + $0x78] sm:$0xff] }
 0x1ec   :  { %2016 = vmatprep.subr.bf16.mxu1 %v1955_v3  ;;  %v4263_v3 = vld [vmem:[#allocation7 + $0x4d4] ss:$8 sps:$4 sm:$0xff]   ;;  %v3852_v5 = vcombine.high %v2524_v0, %v2526_v1 }
 0x1ed   :  { %2465 = vmatprep.subr.bf16.mxu0 %v4263_v3  ;;  %v4273_v3 = vld [vmem:[#allocation7 + $0x510] ss:$8 sps:$4 sm:$0xff]  }
 0x1ee   :  { %2466 = vmatpush1.bf16.msra.mxu0 %v4261_v8  ;;  %v4284_v8 = vld [vmem:[#allocation7 + $0x544] ss:$8 sps:$4 sm:$0xff]  }
 0x1ef   :  { %2017 = vmatpush1.bf16.msra.mxu1 %v1952_v6  ;;  %v2528_v6 = vld [vmem:[#allocation5 + $0xb8] sm:$0xff]  ;;  %2467 = vmatprep.subr.bf16.mxu0 %v4266_v9  ;;  %v4282_v9 = vld [vmem:[#allocation7 + $0x540] ss:$8 sps:$4 sm:$0xff]  }
 0x1f0   :  { %2771 = vmatprep.subr.bf16.mxu1 %v3850_v7  ;;  %v2530_v7 = vld [vmem:[#allocation5 + $0xf8] sm:$0xff] }
 0x1f2   :  { %2031 = vmatmul.mubr.bf16.vlgmr.msra.gmra.mrb[20].mxu1 %v4646_v30 }
 0x1f3   :  { %2772 = vmatpush1.bf16.msra.mxu1 %v3849_v10  ;;  %3889 = vmatprep.mubr.msk.bf16.mxu1 %vm313_vm0, %v4635_v34  ;;  %v3851_v10 = vcombine.low %v2524_v0, %v2526_v1 }
 0x1f4   :  { %2773 = vmatprep.subr.bf16.mxu1 %v3854_v11  ;;  %v3856_v11 = vcombine.high %v2528_v6, %v2530_v7 }
 0x1f7   :  { %2774 = vmatpush1.bf16.msra.mxu1 %v3853_v15  ;;  %v4264_v15 = vld [vmem:[#allocation7 + $0x4e0] ss:$8 sps:$4 sm:$0xff]  }
 0x1f8   :  { %2775 = vmatprep.subr.bf16.mxu1 %v3858_v16  ;;  %v3855_v16 = vcombine.low %v2528_v6, %v2530_v7  ;;  %2468 = vmatpush1.bf16.msra.mxu0 %v4264_v15  ;;  %v4281_v6 = vld [vmem:[#allocation7 + $0x534] ss:$8 sps:$4 sm:$0xff]   ;;  %v4279_v7 = vld [vmem:[#allocation7 + $0x530] ss:$8 sps:$4 sm:$0xff]  }
 0x1f9   :  { %v4293_v15 = vld [vmem:[#allocation7 + $0x574] ss:$8 sps:$4 sm:$0xff]  }
 0x1fb   :  { %2776 = vmatpush1.bf16.msra.mxu1 %v3857_v20  ;;  %v4269_v20 = vld [vmem:[#allocation7 + $0x4f4] ss:$8 sps:$4 sm:$0xff]  }
 0x1fc   :  { %2777 = vmatprep.subr.bf16.mxu1 %v3862_v22  ;;  %v4267_v22 = vld [vmem:[#allocation7 + $0x4f0] ss:$8 sps:$4 sm:$0xff]   ;;  %2469 = vmatprep.subr.bf16.mxu0 %v4269_v20 }
 0x1fd   :  { %2470 = vmatpush1.bf16.msra.mxu0 %v4267_v22 }
 0x1fe   :  { %2480 = vmatprep.subr.bf16.mxu0 %v4272_v26 }
 0x1ff   :  { %2778 = vmatpush1.bf16.msra.mxu1 %v3861_v28  ;;  %v2544_v28 = vld [vmem:[#allocation5 + $0x2b8] sm:$0xff] }
 0x200   :  { %2779 = vmatprep.subr.bf16.mxu1 %v3866_v29  ;;  %v2546_v29 = vld [vmem:[#allocation5 + $0x2f8] sm:$0xff] }
 0x201   :  { %v3872_v32 = vcombine.high %v2544_v28, %v2546_v29 }
 0x203   :  { %2780 = vmatpush1.bf16.msra.mxu1 %v3865_v36  ;;  %v3871_v36 = vcombine.low %v2544_v28, %v2546_v29  ;;  %v4305_v28 = vld [vmem:[#allocation7 + $0x5b4] ss:$8 sps:$4 sm:$0xff]  }
 0x204   :  { %2781 = vmatprep.subr.bf16.mxu1 %v3870_v37  ;;  %v3876_v37 = vcombine.high %v2548_v33, %v2550_v35  ;;  %v4306_v33 = vld [vmem:[#allocation7 + $0x5c0] ss:$8 sps:$4 sm:$0xff]   ;;  %v4311_v35 = vld [vmem:[#allocation7 + $0x5d4] ss:$8 sps:$4 sm:$0xff]  }
 0x207   :  { %2782 = vmatpush1.bf16.msra.mxu1 %v3869_v42  ;;  %v2556_v42 = vld [vmem:[#allocation5 + $0x438] sm:$0xff] }
 0x208   :  { %2783 = vmatprep.subr.bf16.mxu1 %v3874_v43  ;;  %v2558_v43 = vld [vmem:[#allocation5 + $0x478] sm:$0xff] }
 0x209   :  { %v3884_v47 = vcombine.high %v2556_v42, %v2558_v43 }
 0x20b   :  { %2784 = vmatpush1.bf16.msra.mxu1 %v3873_v48  ;;  %v3888_v48 = vcombine.high %v2560_v44, %v2562_v45  ;;  %v4318_v44 = vld [vmem:[#allocation7 + $0x600] ss:$8 sps:$4 sm:$0xff]   ;;  %v4323_v45 = vld [vmem:[#allocation7 + $0x614] ss:$8 sps:$4 sm:$0xff]  }
 0x20c   :  { %2785 = vmatprep.subr.bf16.mxu1 %v3878_v49  ;;  %v3883_v49 = vcombine.low %v2556_v42, %v2558_v43  ;;  %v4320_v42 = vld [vmem:[#allocation7 + $0x604] ss:$8 sps:$4 sm:$0xff]  }
 0x20d   :  { %v2769_v51 = vand.u32 %v3888_v48, %v4641_v13  ;;  %v4270_v13 = vld [vmem:[#allocation7 + $0x500] ss:$8 sps:$4 sm:$0xff]  }
 0x20e   :  { %v4415_v48 = vld [vmem:[#allocation8] sm:$0xff]  }
 0x20f   :  { %2786 = vmatpush1.bf16.msra.mxu1 %v3877_v56 }
 0x210   :  { %2787 = vmatprep.subr.bf16.mxu1 %v3882_v57 }
 0x213   :  { %2788 = vmatpush1.bf16.msra.mxu1 %v3881_v61 }
 0x214   :  { %2789 = vmatprep.subr.bf16.mxu1 %v2763_v63 }
 0x217   :  { %2790 = vmatpush1.bf16.msra.mxu1 %v2760_v4  ;;  %v4278_v4 = vld [vmem:[#allocation7 + $0x524] ss:$8 sps:$4 sm:$0xff]  }
 0x218   :  { %2812 = vmatprep.subr.bf16.mxu1 %v3852_v5  ;;  %v4276_v5 = vld [vmem:[#allocation7 + $0x520] ss:$8 sps:$4 sm:$0xff]  }
 0x21a   :  { %2804 = vmatmul.mubr.bf16.vlgmr.msra.gmra.mrb[24].mxu1 %v4646_v30 }
 0x21b   :  { %2813 = vmatpush1.bf16.msra.mxu1 %v3851_v10  ;;  %3890 = vmatprep.mubr.msk.bf16.mxu1 %vm313_vm0, %v4635_v34  ;;  %v3868_v34 = vcombine.high %v2540_v24, %v2542_v25  ;;  %v4287_v10 = vld [vmem:[#allocation7 + $0x554] ss:$8 sps:$4 sm:$0xff]  }
 0x21c   :  { %2814 = vmatprep.subr.bf16.mxu1 %v3856_v11  ;;  %v4285_v11 = vld [vmem:[#allocation7 + $0x550] ss:$8 sps:$4 sm:$0xff]  }
 0x21f   :  { %2815 = vmatpush1.bf16.msra.mxu1 %v3855_v16  ;;  %v4291_v16 = vld [vmem:[#allocation7 + $0x570] ss:$8 sps:$4 sm:$0xff]  }
 0x220   :  { %2816 = vmatprep.subr.bf16.mxu1 %v3860_v17  ;;  %v4296_v17 = vld [vmem:[#allocation7 + $0x584] ss:$8 sps:$4 sm:$0xff]  }
 0x223   :  { %2817 = vmatpush1.bf16.msra.mxu1 %v3859_v21  ;;  %v4297_v21 = vld [vmem:[#allocation7 + $0x590] ss:$8 sps:$4 sm:$0xff]  }
 0x224   :  { %2818 = vmatprep.subr.bf16.mxu1 %v3864_v23  ;;  %v4302_v23 = vld [vmem:[#allocation7 + $0x5a4] ss:$8 sps:$4 sm:$0xff]  }
 0x227   :  { %2819 = vmatpush1.bf16.msra.mxu1 %v3863_v27 }
 0x228   :  { %2820 = vmatprep.subr.bf16.mxu1 %v3868_v34  ;;  %v4300_v34 = vld [vmem:[#allocation7 + $0x5a0] ss:$8 sps:$4 sm:$0xff]  }
 0x22b   :  { %2821 = vmatpush1.bf16.msra.mxu1 %v3867_v31  ;;  %v4303_v31 = vld [vmem:[#allocation7 + $0x5b0] ss:$8 sps:$4 sm:$0xff]  }
 0x22c   :  { %2822 = vmatprep.subr.bf16.mxu1 %v3872_v32  ;;  %v4308_v32 = vld [vmem:[#allocation7 + $0x5c4] ss:$8 sps:$4 sm:$0xff]  }
 0x22f   :  { %2823 = vmatpush1.bf16.msra.mxu1 %v3871_v36  ;;  %v4309_v36 = vld [vmem:[#allocation7 + $0x5d0] ss:$8 sps:$4 sm:$0xff]  }
 0x230   :  { %2824 = vmatprep.subr.bf16.mxu1 %v3876_v37  ;;  %v4314_v37 = vld [vmem:[#allocation7 + $0x5e4] ss:$8 sps:$4 sm:$0xff]  }
 0x233   :  { %2825 = vmatpush1.bf16.msra.mxu1 %v3875_v40 }
 0x234   :  { %2826 = vmatprep.subr.bf16.mxu1 %v3880_v41  ;;  %v4315_v41 = vld [vmem:[#allocation7 + $0x5f0] ss:$8 sps:$4 sm:$0xff]  }
 0x237   :  { %2827 = vmatpush1.bf16.msra.mxu1 %v3879_v46 }
 0x238   :  { %2828 = vmatprep.subr.bf16.mxu1 %v3884_v47  ;;  %v4414_v47 = vld [vmem:[#allocation8 + $0x40] sm:$0xff]  }
 0x23b   :  { %2829 = vmatpush1.bf16.msra.mxu1 %v3883_v49  ;;  %v4416_v49 = vld [vmem:[#allocation8 + $0x48] sm:$0xff]  }
 0x23c   :  { %2830 = vmatprep.subr.bf16.mxu1 %v2769_v51  ;;  %v4326_v51 = vld [vmem:[#allocation7 + $0x624] ss:$8 sps:$4 sm:$0xff]  }
 0x23f   :  { %2831 = vmatpush1.bf16.msra.mxu1 %v2766_v52  ;;  %v4417_v52 = vld [vmem:[#allocation8 + $0x8] sm:$0xff]  }
 0x240   :  { %3971 = vmatprep.subr.bf16.mxu1 %v4414_v47  ;;  %v4374_v47 = vld [vmem:[#allocation7 + $0x724] ss:$8 sps:$4 sm:$0xff]  }
 0x242   :  { %2845 = vmatmul.mubr.bf16.vlgmr.msra.gmra.mrb[28].mxu1 %v4646_v30 }
 0x243   :  { %3972 = vmatpush3.bf16.msra.mxu1 %v4415_v48  ;;  %v4372_v48 = vld [vmem:[#allocation7 + $0x720] ss:$8 sps:$4 sm:$0xff]  }
 0x244   :  { %3973 = vmatprep.subr.bf16.mxu1 %v4416_v49  ;;  %v4377_v49 = vld [vmem:[#allocation7 + $0x734] ss:$8 sps:$4 sm:$0xff]  }
 0x247   :  { %3974 = vmatpush3.bf16.msra.mxu1 %v4417_v52  ;;  %v4378_v52 = vld [vmem:[#allocation7 + $0x740] ss:$8 sps:$4 sm:$0xff]  }
 0x275   :  { %v4681_v53 = vpop.f32.mrb[12].mxu1 }
 0x276   :  { %v4683_v54 = vpop.f32.mrb[13].mxu1 }
 0x277   :  { %v1304_v55 = vpop.f32.mrb[14].mxu1 }
 0x278   :  { %v1305_v56 = vpop.f32.mrb[15].mxu1  ;;  %v4418_v55 = vld [vmem:[#allocation8 + $0x50] sm:$0xff]  }
 0x279   :  { %v4324_v56 = vld [vmem:[#allocation7 + $0x620] ss:$8 sps:$4 sm:$0xff]   ;;  %3975 = vmatprep.subr.bf16.mxu1 %v4418_v55  ;;  %v4383_v55 = vld [vmem:[#allocation7 + $0x754] ss:$8 sps:$4 sm:$0xff]  }
 0x29d   :  { %v1991_v57 = vpop.f32.mrb[16].mxu1 }
 0x29e   :  { %v2039_v58 = vpack.c.bf16 %v1991_v57, %v1991_v57  ;;  %v1993_v59 = vpop.f32.mrb[17].mxu1  ;;  %v4329_v57 = vld [vmem:[#allocation7 + $0x634] ss:$8 sps:$4 sm:$0xff]  }
 0x29f   :  { %v2040_v60 = vpack.c.bf16 %v1993_v59, %v1993_v59  ;;  %v1995_v61 = vpop.f32.mrb[18].mxu1 }
 0x2a0   :  { %v2047_v62 = vmul.bf16 1036860877, %v2039_v58  ;;  %v1996_v63 = vpop.f32.mrb[19].mxu1  ;;  %vm2043_vm11 = vcmp.gt.bf16.partialorder %v2039_v58, 0  ;;  %v4327_v61 = vld [vmem:[#allocation7 + $0x630] ss:$8 sps:$4 sm:$0xff]  }
 0x2a1   :  { %v2048_v0 = vmul.bf16 1036860877, %v2040_v60  ;;  %vm2044_vm12 = vcmp.gt.bf16.partialorder %v2040_v60, 0  ;;  %v4332_v63 = vld [vmem:[#allocation7 + $0x644] ss:$8 sps:$4 sm:$0xff]  }
 0x2a2   :  { %v2051_v30 = vsel %vm2043_vm11, %v2039_v58, %v2047_v62  ;;  %v4419_v58 = vld [vmem:[#allocation8 + $0x10] sm:$0xff]  }
 0x2a3   :  { %v2052_v1 = vsel %vm2044_vm12, %v2040_v60, %v2048_v0  ;;  %v4420_v60 = vld [vmem:[#allocation8 + $0x58] sm:$0xff]   ;;  %3976 = vmatpush3.bf16.msra.mxu1 %v4419_v58  ;;  %v4384_v58 = vld [vmem:[#allocation7 + $0x760] ss:$8 sps:$4 sm:$0xff]  }
 0x2a4   :  { %2471 = vmatprep.mubr.bf16.mxu0 %v2052_v1  ;;  %3977 = vmatprep.subr.bf16.mxu1 %v4420_v60  ;;  %v4387_v60 = vld [vmem:[#allocation7 + $0x770] ss:$8 sps:$4 sm:$0xff]  }
 0x2a5   :  { %2472 = vmatmul.mubr.bf16.vlgmr.msra.gmra.mrb[4].mxu0 %v2051_v30 }
 0x2a6   :  { %2481 = vmatpush1.bf16.msra.mxu0 %v4270_v13 }
 0x2a7   :  { %2482 = vmatprep.subr.bf16.mxu0 %v4275_v2  ;;  %v4421_v2 = vld [vmem:[#allocation8 + $0x18] sm:$0xff]  }
 0x2a8   :  { %3978 = vmatpush3.bf16.msra.mxu1 %v4421_v2  ;;  %v4401_v2 = vld [vmem:[#allocation7 + $0x7b4] ss:$8 sps:$4 sm:$0xff]  }
 0x2aa   :  { %2483 = vmatpush1.bf16.msra.mxu0 %v4273_v3  ;;  %v4422_v3 = vld [vmem:[#allocation8 + $0x60] sm:$0xff]  }
 0x2ab   :  { %2484 = vmatprep.subr.bf16.mxu0 %v4278_v4  ;;  %v4330_v4 = vld [vmem:[#allocation7 + $0x640] ss:$8 sps:$4 sm:$0xff]   ;;  %3979 = vmatprep.subr.bf16.mxu1 %v4422_v3  ;;  %v4404_v3 = vld [vmem:[#allocation7 + $0x7c4] ss:$8 sps:$4 sm:$0xff]  }
 0x2ae   :  { %2485 = vmatpush1.bf16.msra.mxu0 %v4276_v5  ;;  %v4335_v5 = vld [vmem:[#allocation7 + $0x654] ss:$8 sps:$4 sm:$0xff]  }
 0x2af   :  { %2486 = vmatprep.subr.bf16.mxu0 %v4281_v6 }
 0x2b2   :  { %2487 = vmatpush1.bf16.msra.mxu0 %v4279_v7  ;;  %v4423_v7 = vld [vmem:[#allocation8 + $0x20] sm:$0xff]  }
 0x2b3   :  { %2488 = vmatprep.subr.bf16.mxu0 %v4284_v8  ;;  %v4424_v8 = vld [vmem:[#allocation8 + $0x68] sm:$0xff]   ;;  %3980 = vmatpush3.bf16.msra.mxu1 %v4423_v7 }
 0x2b4   :  { %3981 = vmatprep.subr.bf16.mxu1 %v4424_v8  ;;  %v4410_v7 = vld [vmem:[#allocation7 + $0x7e4] ss:$8 sps:$4 sm:$0xff]   ;;  %v4408_v8 = vld [vmem:[#allocation7 + $0x7e0] ss:$8 sps:$4 sm:$0xff]  }
 0x2b6   :  { %2489 = vmatpush1.bf16.msra.mxu0 %v4282_v9  ;;  %v4333_v9 = vld [vmem:[#allocation7 + $0x650] ss:$8 sps:$4 sm:$0xff]  }
 0x2b7   :  { %2490 = vmatprep.subr.bf16.mxu0 %v4287_v10  ;;  %v4338_v10 = vld [vmem:[#allocation7 + $0x664] ss:$8 sps:$4 sm:$0xff]  }
 0x2ba   :  { %2491 = vmatpush1.bf16.msra.mxu0 %v4285_v11  ;;  %v4425_v11 = vld [vmem:[#allocation8 + $0x28] sm:$0xff]  }
 0x2bb   :  { %2492 = vmatprep.subr.bf16.mxu0 %v4290_v12  ;;  %v4336_v12 = vld [vmem:[#allocation7 + $0x660] ss:$8 sps:$4 sm:$0xff]   ;;  %3982 = vmatpush3.bf16.msra.mxu1 %v4425_v11  ;;  %v4411_v11 = vld [vmem:[#allocation7 + $0x7f0] ss:$8 sps:$4 sm:$0xff]  }
 0x2be   :  { %2493 = vmatpush1.bf16.msra.mxu0 %v4288_v14  ;;  %v4341_v14 = vld [vmem:[#allocation7 + $0x674] ss:$8 sps:$4 sm:$0xff]  }
 0x2bf   :  { %2494 = vmatprep.subr.bf16.mxu0 %v4293_v15  ;;  %v4339_v15 = vld [vmem:[#allocation7 + $0x670] ss:$8 sps:$4 sm:$0xff]  }
 0x2c2   :  { %2495 = vmatpush1.bf16.msra.mxu0 %v4291_v16  ;;  %v4344_v16 = vld [vmem:[#allocation7 + $0x684] ss:$8 sps:$4 sm:$0xff]  }
 0x2c3   :  { %2496 = vmatprep.subr.bf16.mxu0 %v4296_v17  ;;  %v4342_v17 = vld [vmem:[#allocation7 + $0x680] ss:$8 sps:$4 sm:$0xff]  }
 0x2c5   :  { %v2032_v20 = vpop.f32.mrb[20].mxu1 }
 0x2c6   :  { %2497 = vmatpush1.bf16.msra.mxu0 %v4294_v18  ;;  %v2034_v22 = vpop.f32.mrb[21].mxu1  ;;  %v2041_v40 = vpack.c.bf16 %v2032_v20, %v2032_v20  ;;  %v4347_v18 = vld [vmem:[#allocation7 + $0x694] ss:$8 sps:$4 sm:$0xff]   ;;  %v4350_v20 = vld [vmem:[#allocation7 + $0x6a4] ss:$8 sps:$4 sm:$0xff]  }
 0x2c7   :  { %2498 = vmatprep.subr.bf16.mxu0 %v4299_v19  ;;  %v2042_v24 = vpack.c.bf16 %v2034_v22, %v2034_v22  ;;  %v2036_v25 = vpop.f32.mrb[22].mxu1  ;;  %v4345_v19 = vld [vmem:[#allocation7 + $0x690] ss:$8 sps:$4 sm:$0xff]   ;;  %v4353_v22 = vld [vmem:[#allocation7 + $0x6b4] ss:$8 sps:$4 sm:$0xff]  }
 0x2c8   :  { %v2037_v26 = vpop.f32.mrb[23].mxu1  ;;  %v2049_v43 = vmul.bf16 1036860877, %v2041_v40  ;;  %vm2045_vm14 = vcmp.gt.bf16.partialorder %v2041_v40, 0  ;;  %v4354_v25 = vld [vmem:[#allocation7 + $0x6c0] ss:$8 sps:$4 sm:$0xff]  }
 0x2c9   :  { %v2050_v27 = vmul.bf16 1036860877, %v2042_v24  ;;  %vm2046_vm13 = vcmp.gt.bf16.partialorder %v2042_v24, 0  ;;  %v4359_v26 = vld [vmem:[#allocation7 + $0x6d4] ss:$8 sps:$4 sm:$0xff]  }
 0x2ca   :  { %2499 = vmatpush1.bf16.msra.mxu0 %v4297_v21  ;;  %v2053_v46 = vsel %vm2045_vm14, %v2041_v40, %v2049_v43  ;;  %v4348_v21 = vld [vmem:[#allocation7 + $0x6a0] ss:$8 sps:$4 sm:$0xff]   ;;  %v4371_v43 = vld [vmem:[#allocation7 + $0x714] ss:$8 sps:$4 sm:$0xff]  }
 0x2cb   :  { %2500 = vmatprep.subr.bf16.mxu0 %v4302_v23  ;;  %v2054_v29 = vsel %vm2046_vm13, %v2042_v24, %v2050_v27  ;;  %v4351_v23 = vld [vmem:[#allocation7 + $0x6b0] ss:$8 sps:$4 sm:$0xff]   ;;  %v4356_v24 = vld [vmem:[#allocation7 + $0x6c4] ss:$8 sps:$4 sm:$0xff]  }
 0x2cc   :  { %2512 = vmatprep.mubr.bf16.mxu0 %v2054_v29  ;;  %v4362_v29 = vld [vmem:[#allocation7 + $0x6e4] ss:$8 sps:$4 sm:$0xff]  }
 0x2ce   :  { %2501 = vmatpush1.bf16.msra.mxu0 %v4300_v34  ;;  %v4357_v34 = vld [vmem:[#allocation7 + $0x6d0] ss:$8 sps:$4 sm:$0xff]  }
 0x2cf   :  { %2502 = vmatprep.subr.bf16.mxu0 %v4305_v28 }
 0x2d2   :  { %2503 = vmatpush1.bf16.msra.mxu0 %v4303_v31 }
 0x2d3   :  { %2504 = vmatprep.subr.bf16.mxu0 %v4308_v32 }
 0x2d6   :  { %2505 = vmatpush1.bf16.msra.mxu0 %v4306_v33  ;;  %v4360_v33 = vld [vmem:[#allocation7 + $0x6e0] ss:$8 sps:$4 sm:$0xff]  }
 0x2d7   :  { %2506 = vmatprep.subr.bf16.mxu0 %v4311_v35  ;;  %v4365_v35 = vld [vmem:[#allocation7 + $0x6f4] ss:$8 sps:$4 sm:$0xff]  }
 0x2da   :  { %2507 = vmatpush1.bf16.msra.mxu0 %v4309_v36 }
 0x2db   :  { %2508 = vmatprep.subr.bf16.mxu0 %v4314_v37 }
 0x2de   :  { %2509 = vmatpush1.bf16.msra.mxu0 %v4312_v38  ;;  %v4363_v38 = vld [vmem:[#allocation7 + $0x6f0] ss:$8 sps:$4 sm:$0xff]  }
 0x2df   :  { %2510 = vmatprep.subr.bf16.mxu0 %v4317_v39  ;;  %v4368_v39 = vld [vmem:[#allocation7 + $0x704] ss:$8 sps:$4 sm:$0xff]  }
 0x2e2   :  { %2511 = vmatpush1.bf16.msra.mxu0 %v4315_v41 }
 0x2e3   :  { %3253 = vmatprep.subr.bf16.mxu0 %v4320_v42  ;;  %v4366_v42 = vld [vmem:[#allocation7 + $0x700] ss:$8 sps:$4 sm:$0xff]  }
 0x2e5   :  { %2513 = vmatmul.mubr.bf16.vlgmr.msra.gmra.mrb[4].mxu0 %v2053_v46  ;;  %v4369_v46 = vld [vmem:[#allocation7 + $0x710] ss:$8 sps:$4 sm:$0xff]  }
 0x2e6   :  { %3254 = vmatpush1.bf16.msra.mxu0 %v4318_v44 }
 0x2e7   :  { %3255 = vmatprep.subr.bf16.mxu0 %v4323_v45 }
 0x2ea   :  { %3256 = vmatpush1.bf16.msra.mxu0 %v4321_v50  ;;  %v4375_v50 = vld [vmem:[#allocation7 + $0x730] ss:$8 sps:$4 sm:$0xff]  }
 0x2eb   :  { %3257 = vmatprep.subr.bf16.mxu0 %v4326_v51  ;;  %v4380_v51 = vld [vmem:[#allocation7 + $0x744] ss:$8 sps:$4 sm:$0xff]  }
 0x2ed   :  { %v4685_v59 = vpop.f32.mrb[24].mxu1 }
 0x2ee   :  { %3258 = vmatpush1.bf16.msra.mxu0 %v4324_v56  ;;  %v2807_v62 = vpop.f32.mrb[25].mxu1  ;;  %v2853_v37 = vpack.c.bf16 %v4685_v59, %v4685_v59  ;;  %v4381_v56 = vld [vmem:[#allocation7 + $0x750] ss:$8 sps:$4 sm:$0xff]   ;;  %v4389_v59 = vld [vmem:[#allocation7 + $0x774] ss:$8 sps:$4 sm:$0xff]  }
 0x2ef   :  { %3259 = vmatprep.subr.bf16.mxu0 %v4329_v57  ;;  %v2854_v0 = vpack.c.bf16 %v2807_v62, %v2807_v62  ;;  %v2809_v13 = vpop.f32.mrb[26].mxu1  ;;  %v4386_v57 = vld [vmem:[#allocation7 + $0x764] ss:$8 sps:$4 sm:$0xff]   ;;  %v4390_v62 = vld [vmem:[#allocation7 + $0x780] ss:$8 sps:$4 sm:$0xff]  }
 0x2f0   :  { %v2810_v1 = vpop.f32.mrb[27].mxu1  ;;  %v2861_v41 = vmul.bf16 1036860877, %v2853_v37  ;;  %vm2857_vm1 = vcmp.gt.bf16.partialorder %v2853_v37, 0  ;;  %v4398_v13 = vld [vmem:[#allocation7 + $0x7a4] ss:$8 sps:$4 sm:$0xff]  }
 0x2f1   :  { %v2862_v30 = vmul.bf16 1036860877, %v2854_v0  ;;  %vm2858_vm15 = vcmp.gt.bf16.partialorder %v2854_v0, 0  ;;  %v4396_v1 = vld [vmem:[#allocation7 + $0x7a0] ss:$8 sps:$4 sm:$0xff]  }
 0x2f2   :  { %3260 = vmatpush1.bf16.msra.mxu0 %v4327_v61  ;;  %v2865_v45 = vsel %vm2857_vm1, %v2853_v37, %v2861_v41  ;;  %v4392_v61 = vld [vmem:[#allocation7 + $0x784] ss:$8 sps:$4 sm:$0xff]  }
 0x2f3   :  { %3261 = vmatprep.subr.bf16.mxu0 %v4332_v63  ;;  %v2866_v6 = vsel %vm2858_vm15, %v2854_v0, %v2862_v30  ;;  %v4395_v63 = vld [vmem:[#allocation7 + $0x794] ss:$8 sps:$4 sm:$0xff]   ;;  %v4393_v0 = vld [vmem:[#allocation7 + $0x790] ss:$8 sps:$4 sm:$0xff]  }
 0x2f4   :  { %3285 = vmatprep.mubr.bf16.mxu0 %v2866_v6  ;;  %v4399_v30 = vld [vmem:[#allocation7 + $0x7b0] ss:$8 sps:$4 sm:$0xff]  }
 0x2f5   :  { %v4405_v6 = vld [vmem:[#allocation7 + $0x7d0] ss:$8 sps:$4 sm:$0xff]  }
 0x2f6   :  { %3262 = vmatpush1.bf16.msra.mxu0 %v4330_v4  ;;  %v4402_v4 = vld [vmem:[#allocation7 + $0x7c0] ss:$8 sps:$4 sm:$0xff]  }
 0x2f7   :  { %3263 = vmatprep.subr.bf16.mxu0 %v4335_v5  ;;  %v4407_v5 = vld [vmem:[#allocation7 + $0x7d4] ss:$8 sps:$4 sm:$0xff]  }
 0x2fa   :  { %3264 = vmatpush1.bf16.msra.mxu0 %v4333_v9  ;;  %v4413_v9 = vld [vmem:[#allocation7 + $0x7f4] ss:$8 sps:$4 sm:$0xff]  }
 0x2fb   :  { %3265 = vmatprep.subr.bf16.mxu0 %v4338_v10 }
 0x2fe   :  { %3266 = vmatpush1.bf16.msra.mxu0 %v4336_v12 }
 0x2ff   :  { %3267 = vmatprep.subr.bf16.mxu0 %v4341_v14 }
 0x302   :  { %3268 = vmatpush1.bf16.msra.mxu0 %v4339_v15  ;;  %v4426_v15 = vld [vmem:[#allocation8 + $0x70] sm:$0xff]  }
 0x303   :  { %3269 = vmatprep.subr.bf16.mxu0 %v4344_v16  ;;  %v4427_v16 = vld [vmem:[#allocation8 + $0x30] sm:$0xff]   ;;  %3983 = vmatprep.subr.bf16.mxu1 %v4426_v15 }
 0x304   :  { %3984 = vmatpush3.bf16.msra.mxu1 %v4427_v16 }
 0x306   :  { %3270 = vmatpush1.bf16.msra.mxu0 %v4342_v17  ;;  %v4428_v17 = vld [vmem:[#allocation8 + $0x78] sm:$0xff]  }
 0x307   :  { %3271 = vmatprep.subr.bf16.mxu0 %v4347_v18  ;;  %v4429_v18 = vld [vmem:[#allocation8 + $0x38] sm:$0xff]   ;;  %3985 = vmatprep.subr.bf16.mxu1 %v4428_v17 }
 0x308   :  { %3986 = vmatpush3.bf16.msra.mxu1 %v4429_v18 }
 0x30a   :  { %3272 = vmatpush1.bf16.msra.mxu0 %v4345_v19 }
 0x30b   :  { %3273 = vmatprep.subr.bf16.mxu0 %v4350_v20 }
 0x30e   :  { %3274 = vmatpush1.bf16.msra.mxu0 %v4348_v21 }
 0x30f   :  { %3275 = vmatprep.subr.bf16.mxu0 %v4353_v22 }
 0x312   :  { %3276 = vmatpush1.bf16.msra.mxu0 %v4351_v23 }
 0x313   :  { %3277 = vmatprep.subr.bf16.mxu0 %v4356_v24 }
 0x315   :  { %v4687_v27 = vpop.f32.mrb[28].mxu1 }
 0x316   :  { %3278 = vmatpush1.bf16.msra.mxu0 %v4354_v25  ;;  %v2848_v28 = vpop.f32.mrb[29].mxu1  ;;  %v2855_v10 = vpack.c.bf16 %v4687_v27, %v4687_v27 }
 0x317   :  { %3279 = vmatprep.subr.bf16.mxu0 %v4359_v26  ;;  %v2850_v31 = vpop.f32.mrb[30].mxu1  ;;  %v2856_v36 = vpack.c.bf16 %v2848_v28, %v2848_v28 }
 0x318   :  { %v2851_v32 = vpop.f32.mrb[31].mxu1  ;;  %v2863_v12 = vmul.bf16 1036860877, %v2855_v10  ;;  %vm2859_vm2 = vcmp.gt.bf16.partialorder %v2855_v10, 0 }
 0x319   :  { %v2864_v40 = vmul.bf16 1036860877, %v2856_v36  ;;  %vm2860_vm0 = vcmp.gt.bf16.partialorder %v2856_v36, 0 }
 0x31a   :  { %3280 = vmatpush1.bf16.msra.mxu0 %v4357_v34  ;;  %v2867_v14 = vsel %vm2859_vm2, %v2855_v10, %v2863_v12 }
 0x31b   :  { %3281 = vmatprep.subr.bf16.mxu0 %v4362_v29  ;;  %v2868_v44 = vsel %vm2860_vm0, %v2856_v36, %v2864_v40 }
 0x31e   :  { %3282 = vmatpush1.bf16.msra.mxu0 %v4360_v33 }
 0x31f   :  { %3283 = vmatprep.subr.bf16.mxu0 %v4365_v35 }
 0x322   :  { %3284 = vmatpush1.bf16.msra.mxu0 %v4363_v38 }
 0x323   :  { %3294 = vmatprep.subr.bf16.mxu0 %v4368_v39 }
 0x325   :  { %3286 = vmatmul.mubr.bf16.vlgmr.msra.gmra.mrb[4].mxu0 %v2865_v45 }
 0x326   :  { %3295 = vmatpush1.bf16.msra.mxu0 %v4366_v42  ;;  %3326 = vmatprep.mubr.bf16.mxu0 %v2868_v44 }
 0x327   :  { %3296 = vmatprep.subr.bf16.mxu0 %v4371_v43 }
 0x32a   :  { %3297 = vmatpush1.bf16.msra.mxu0 %v4369_v46 }
 0x32b   :  { %3298 = vmatprep.subr.bf16.mxu0 %v4374_v47 }
 0x32e   :  { %3299 = vmatpush1.bf16.msra.mxu0 %v4372_v48 }
 0x32f   :  { %3300 = vmatprep.subr.bf16.mxu0 %v4377_v49 }
 0x332   :  { %3301 = vmatpush1.bf16.msra.mxu0 %v4375_v50 }
 0x333   :  { %3302 = vmatprep.subr.bf16.mxu0 %v4380_v51 }
 0x336   :  { %3303 = vmatpush1.bf16.msra.mxu0 %v4378_v52 }
 0x337   :  { %3304 = vmatprep.subr.bf16.mxu0 %v4383_v55 }
 0x33a   :  { %3305 = vmatpush1.bf16.msra.mxu0 %v4381_v56 }
 0x33b   :  { %3306 = vmatprep.subr.bf16.mxu0 %v4386_v57 }
 0x33e   :  { %3307 = vmatpush1.bf16.msra.mxu0 %v4384_v58 }
 0x33f   :  { %3308 = vmatprep.subr.bf16.mxu0 %v4389_v59 }
 0x342   :  { %3309 = vmatpush1.bf16.msra.mxu0 %v4387_v60 }
 0x343   :  { %3310 = vmatprep.subr.bf16.mxu0 %v4392_v61 }
 0x346   :  { %3311 = vmatpush1.bf16.msra.mxu0 %v4390_v62 }
 0x347   :  { %3312 = vmatprep.subr.bf16.mxu0 %v4395_v63 }
 0x34a   :  { %3313 = vmatpush1.bf16.msra.mxu0 %v4393_v0 }
 0x34b   :  { %3314 = vmatprep.subr.bf16.mxu0 %v4398_v13 }
 0x34e   :  { %3315 = vmatpush1.bf16.msra.mxu0 %v4396_v1 }
 0x34f   :  { %3316 = vmatprep.subr.bf16.mxu0 %v4401_v2 }
 0x352   :  { %3317 = vmatpush1.bf16.msra.mxu0 %v4399_v30 }
 0x353   :  { %3318 = vmatprep.subr.bf16.mxu0 %v4404_v3 }
 0x356   :  { %3319 = vmatpush1.bf16.msra.mxu0 %v4402_v4 }
 0x357   :  { %3320 = vmatprep.subr.bf16.mxu0 %v4407_v5 }
 0x35a   :  { %3321 = vmatpush1.bf16.msra.mxu0 %v4405_v6 }
 0x35b   :  { %3322 = vmatprep.subr.bf16.mxu0 %v4410_v7 }
 0x35e   :  { %3323 = vmatpush1.bf16.msra.mxu0 %v4408_v8 }
 0x35f   :  { %3324 = vmatprep.subr.bf16.mxu0 %v4413_v9 }
 0x362   :  { %3325 = vmatpush1.bf16.msra.mxu0 %v4411_v11 }
 0x365   :  { %3327 = vmatmul.mubr.bf16.vlgmr.msra.gmra.mrb[4].mxu0 %v2867_v14 }
 0x438   :  { %v3328_v19 = vpop.f32.mrb[4].mxu0 }
 0x439   :  { %v3993_v20 = vadd.f32 %v3328_v19, %v4681_v53  ;;  %v3330_v21 = vpop.f32.mrb[5].mxu0 }
 0x43a   :  { %v3994_v22 = vadd.f32 %v3330_v21, %v4683_v54  ;;  %v3332_v23 = vpop.f32.mrb[6].mxu0 }
 0x43b   :  { %v3337_v24 = vpack.c.bf16 %v3993_v20, %v3993_v20  ;;  %v3333_v25 = vpop.f32.mrb[7].mxu0 }
 0x43c   :  { %v3338_v26 = vpack.c.bf16 %v3994_v22, %v3994_v22 }
 0x43d   :  { %v3341_v27 = vmul.bf16 1036860877, %v3337_v24  ;;  %vm3339_vm3 = vcmp.gt.bf16.partialorder %v3337_v24, 0 }
 0x43e   :  { %v3342_v34 = vmul.bf16 1036860877, %v3338_v26  ;;  %vm3340_vm4 = vcmp.gt.bf16.partialorder %v3338_v26, 0 }
 0x43f   :  { %v3343_v29 = vsel %vm3339_vm3, %v3337_v24, %v3341_v27 }
 0x440   :  { %v3344_v28 = vsel %vm3340_vm4, %v3338_v26, %v3342_v34 }
 0x441   :  { %3505 = vmatprep.mubr.bf16.mxu1 %v3344_v28 }
 0x442   :  { %3506 = vmatmul.mubr.bf16.vlgmr.msra.gmra.mrb[32].mxu1 %v3343_v29 }
 0x515   :  { %v3987_v31 = vpop.f32.mrb[32].mxu1 }
 0x516   :  { %v3988_v32 = vpop.f32.mrb[33].mxu1 }
 0x517   :  { %v3989_v53 = vadd.f32 %v3988_v32, %v3987_v31  ;;  %v3990_v33 = vpop.f32.mrb[34].mxu1 }
 0x518   :  { %v3991_v54 = vpop.f32.mrb[35].mxu1 }
 0x519   :  { %3513 = vst [vmem:[#allocation10] sm:$0xff] %v3989_v53 }
 0x51a   :  { %4529 = shalt.err (!%p4526_p8)
}
 0x51b   :  { %s4530_s16 = scalar_lea.hbm %s4711_s4, 128 }
 0x51c   :  { %p4531_p9 = scmp.ne.s32.totalorder %s4711_s4, %s4530_s16  ;;  %p4534_p10 = scmp.lt.u32.totalorder %s4530_s16, %s4711_s4 }
 0x51e   :  { %p4536_p11 = pnand %p4534_p10, %p4531_p9 }
 0x520   :  { %4539 = shalt.err (!%p4536_p11)
}
 0x521   :  { %3523 = dma.vmem_to_hbm [thread:$0]  %s3521_s26, 128, %s4711_s4, [#allocation4]  }
 0x522   :  { %4546 = dma.done.wait [#allocation4], 128  }
 0x523   :  { %4547 = vsyncadd [#allocation4], 4294967168 }
 0x524   :  { %3527 = vsyncpa [#allocation3], 1 }
 0x525   :  { %3528 = vsyncpa [#allocation6], 1 }
 0x526   :  { %3529 = vsyncpa [#allocation9], 1 }
 0x527   :  { %3530 = vsyncpa [#allocation4], 1 }

</bundles_post_ra>
